<compile_context>
chip_gen: v7x
topology: tpu7x:2x2x1
jax: 0.10.0
libtpu: 0.0.40
codegen_flags: <defaults>
</compile_context>

<pallas_src>
import functools
import math

import jax
import jax.numpy as jnp
from jax.experimental import pallas as pl
from jax.experimental.pallas import tpu as pltpu


def _round_up(x: int, m: int) -> int:
    return ((x + m - 1) // m) * m


# ---------------------------------------------------------------------------
# Fused kernel: whole MLP (Linear + ReLU per layer, skip via split matmul)
# ---------------------------------------------------------------------------
def _fused_mlp_kernel(layer_is_skip, x_ref, z_ref, b_ref, *refs):
    """refs = (*weight_refs, o_ref).

    weight_refs per layer (in order):
      - non-skip layer: (W  [dimin, hidden],)          bf16
      - skip layer:     (Wy [hidden, hidden], Wz [skip, hidden])  bf16
    x_ref/z_ref: bf16 row tiles; b_ref: f32 packed biases [n_layers, hidden].
    """
    o_ref = refs[-1]
    w_refs = refs[:-1]

    y16 = x_ref[...]                                       # bf16 [TM, in_dim]
    z16 = z_ref[...] if any(layer_is_skip) else None       # bf16 [TM, skip]
    y = None
    wi = 0
    for li, is_skip in enumerate(layer_is_skip):           # static -> unrolled
        acc = jnp.dot(y16, w_refs[wi][...],
                      preferred_element_type=jnp.float32)
        wi += 1
        if is_skip:
            # cat(y, z) @ W  ==  y @ W_y + z @ W_z  (no concat needed)
            acc = acc + jnp.dot(z16, w_refs[wi][...],
                                preferred_element_type=jnp.float32)
            wi += 1
        y = jnp.maximum(acc + b_ref[li:li + 1, :], 0.0)    # f32 bias + ReLU
        y16 = y.astype(jnp.bfloat16)                       # next matmul operand
    o_ref[...] = y.astype(o_ref.dtype)


# ---------------------------------------------------------------------------
# Module: MLPWithInputSkips (JAX/Pallas version)
# ---------------------------------------------------------------------------
class MLPWithInputSkips:
    SUBLANE = 8

    def __init__(
        self,
        n_layers: int,
        input_dim: int,
        output_dim: int,   # NOTE: unused by the reference module's forward
        skip_dim: int,
        hidden_dim: int,
        input_skips,
        *,
        key: jax.Array,
    ):
        if n_layers < 1:
            raise ValueError("n_layers must be >= 1")
        self._input_skips = set(input_skips)
        if 0 in self._input_skips:
            raise ValueError(
                "input_skips containing layer 0 is not supported (the "
                "reference module's layer-0 Linear has dimin=input_dim).")
        self.n_layers = n_layers
        self.input_dim = input_dim
        self.skip_dim = skip_dim
        self.hidden_dim = hidden_dim

        self.weights = []        # unpadded f32 (w [dimin, dimout], b [1, dimout])
        self._w_params = []      # bf16 weights for the kernel (VMEM residents)
        biases = []
        layer_is_skip = []

        for layeri in range(n_layers):
            if layeri == 0:
                dimin, dimout = input_dim, hidden_dim
            elif layeri in self._input_skips:
                dimin, dimout = hidden_dim + skip_dim, hidden_dim
            else:
                dimin, dimout = hidden_dim, hidden_dim

            # Deterministic init (PyTorch-Linear-style uniform bounds).
            kw, kb = jax.random.split(jax.random.fold_in(key, layeri))
            bound = 1.0 / math.sqrt(dimin)
            w = jax.random.uniform(kw, (dimin, dimout), jnp.float32,
                                   minval=-bound, maxval=bound)
            b = jax.random.uniform(kb, (1, dimout), jnp.float32,
                                   minval=-bound, maxval=bound)
            self.weights.append((w, b))
            biases.append(b)

            is_skip = layeri in self._input_skips
            layer_is_skip.append(is_skip)

            w16 = w.astype(jnp.bfloat16)
            if is_skip:
                # Split cat(y, z) @ W into y @ W_y + z @ W_z.
                self._w_params += [w16[:hidden_dim], w16[hidden_dim:]]
            else:
                self._w_params.append(w16)

        self._layer_is_skip = tuple(layer_is_skip)
        self._bias_pack = jnp.concatenate(biases, axis=0)  # [n_layers, hidden] f32

        # Per-generation limits from the actual chip (fallback: v7x-safe).
        try:
            self._vmem_cap = int(pltpu.get_tpu_info().vmem_capacity_bytes)
        except Exception:
            self._vmem_cap = 64 << 20
        # Bigger row tiles on v5e/v6e (128 MiB VMEM), smaller on v7x (64 MiB).
        self._max_tm = 1024 if self._vmem_cap >= (100 << 20) else 512

    # -----------------------------------------------------------------------
    def __call__(self, x: jax.Array, z: jax.Array) -> jax.Array:
        # x: [..., input_dim], z: [..., skip_dim]
        lead = x.shape[:-1]
        M = math.prod(lead) if lead else 1
        # Pass matmul operands as bf16 (halves x/z HBM traffic; f32 accum in MXU).
        x2d = x.reshape(M, x.shape[-1]).astype(jnp.bfloat16)
        z2d = z.reshape(M, z.shape[-1]).astype(jnp.bfloat16)

        # Row tiling: at least 2 grid steps when possible (v7x has 2 TCs and
        # "parallel" shards the grid across them); TM a multiple of 8.
        if M <= self.SUBLANE:
            TM, Mp = M, M                      # single full-extent block
        else:
            TM = min(self._max_tm, _round_up((M + 1) // 2, self.SUBLANE))
            Mp = _round_up(M, TM)
        grid = (Mp // TM,)

        if Mp > M:                             # cheap trailing-row pad only
            x2d = jnp.pad(x2d, ((0, Mp - M), (0, 0)))
            z2d = jnp.pad(z2d, ((0, Mp - M), (0, 0)))

        # Prefer single-buffered resident weights (pl.Buffered(1)); fall back
        # to the default (double-buffered) specs if this JAX rejects it.
        try:
            out = self._pallas_forward(x2d, z2d, TM, Mp, grid,
                                       single_buffer_params=True)
        except Exception:
            out = self._pallas_forward(x2d, z2d, TM, Mp, grid,
                                       single_buffer_params=False)

        y = out[:M] if Mp > M else out
        return y.reshape(lead + (self.hidden_dim,))

    # -----------------------------------------------------------------------
    def _pallas_forward(self, x2d, z2d, TM, Mp, grid, single_buffer_params):
        in_dim = x2d.shape[-1]
        sk_dim = z2d.shape[-1]
        hid = self.hidden_dim

        param_kw = {}
        if single_buffer_params:
            param_kw = dict(pipeline_mode=pl.Buffered(1))

        in_specs = [
            pl.BlockSpec((TM, in_dim), lambda i: (i, 0)),
            pl.BlockSpec((TM, sk_dim), lambda i: (i, 0)),
            # Packed biases + all weights: full block, constant index map
            # -> DMA'd once, VMEM-resident across all grid steps.
            pl.BlockSpec(self._bias_pack.shape, lambda i: (0, 0), **param_kw),
        ]
        for p in self._w_params:
            in_specs.append(pl.BlockSpec(p.shape, lambda i: (0, 0), **param_kw))

        out_spec = pl.BlockSpec((TM, hid), lambda i: (i, 0))

        # Advisory cost estimate (matmul flops dominate).
        flops = sum(2 * Mp * p.shape[0] * p.shape[1] for p in self._w_params)
        param_bytes = (sum(int(p.size) * p.dtype.itemsize for p in self._w_params)
                       + int(self._bias_pack.size) * 4)
        bytes_accessed = (int(x2d.size) * 2 + int(z2d.size) * 2
                          + Mp * hid * 4 + param_bytes)
        cost = pl.CostEstimate(flops=flops, transcendentals=0,
                               bytes_accessed=bytes_accessed)

        # VMEM budget from actual buffer counts:
        #   2x (double-buffered) x/z/out row tiles, resident params x buffer
        #   count, plus headroom for the unrolled per-layer temporaries.
        tile_bytes = 2 * TM * (2 * in_dim + 2 * sk_dim + 4 * hid)
        param_buf = 1 if single_buffer_params else 2
        temp_bytes = 6 * TM * max(hid, in_dim, sk_dim) * 4
        needed = tile_bytes + param_buf * param_bytes + temp_bytes + (4 << 20)
        cap = max(16 << 20, int(self._vmem_cap * 0.85))   # headroom below physical
        vmem_limit = int(min(max(needed, 16 << 20), cap))

        kernel = functools.partial(_fused_mlp_kernel, self._layer_is_skip)
        return pl.pallas_call(
            kernel,
            out_shape=jax.ShapeDtypeStruct((Mp, hid), jnp.float32),
            grid=grid,
            in_specs=in_specs,
            out_specs=out_spec,
            compiler_params=pltpu.CompilerParams(
                dimension_semantics=("parallel",),
                vmem_limit_bytes=vmem_limit,
            ),
            cost_estimate=cost,
        )(x2d, z2d, self._bias_pack, *self._w_params)


# ---------------------------------------------------------------------------
# Reference (pure JAX, same bf16-operand / f32-accumulate math) for checking
# ---------------------------------------------------------------------------
def reference_forward(mlp: MLPWithInputSkips, x, z):
    lead = x.shape[:-1]
    M = math.prod(lead) if lead else 1
    y16 = x.reshape(M, x.shape[-1]).astype(jnp.bfloat16)
    z16 = z.reshape(M, z.shape[-1]).astype(jnp.bfloat16)
    y = None
    for li, (w, b) in enumerate(mlp.weights):
        inp = y16
        if li in mlp._input_skips:
            inp = jnp.concatenate((y16, z16), axis=-1)
        acc = jnp.dot(inp, w.astype(jnp.bfloat16),
                      preferred_element_type=jnp.float32)
        y = jnp.maximum(acc + b, 0.0)
        y16 = y.astype(jnp.bfloat16)
    return y.reshape(lead + (y.shape[-1],))


if __name__ == "__main__":
    key = jax.random.PRNGKey(0)
    k_param, k_x, k_z = jax.random.split(key, 3)

    n_layers = 4
    input_dim = 16
    output_dim = 32   # unused by forward (mirrors the reference module)
    skip_dim = 16
    hidden_dim = 32
    input_skips = (2,)

    mlp = MLPWithInputSkips(
        n_layers, input_dim, output_dim, skip_dim, hidden_dim, input_skips,
        key=k_param,
    )

    batch, seq = 2, 8
    x = jax.random.normal(k_x, (batch, seq, input_dim), jnp.float32)
    z = jax.random.normal(k_z, (batch, seq, skip_dim), jnp.float32)

    out = jax.block_until_ready(mlp(x, z))

    ref = reference_forward(mlp, x, z)
    assert out.shape == (batch, seq, hidden_dim), out.shape
    max_err = float(jnp.max(jnp.abs(out - ref)))
    assert jnp.allclose(out, ref, atol=1e-4, rtol=1e-4), f"mismatch: {max_err}"

    print("KERNEL_OK")
</pallas_src>

<mosaic_0001>
module attributes {stable_mosaic.version = 11 : i64} {
  func.func @_fused_mlp_kernel(%arg0: i32, %arg1: memref<8x16xbf16, #tpu.memory_space<vmem>>, %arg2: memref<8x16xbf16, #tpu.memory_space<vmem>>, %arg3: memref<4x32xf32, #tpu.memory_space<vmem>>, %arg4: memref<16x32xbf16, #tpu.memory_space<vmem>>, %arg5: memref<32x32xbf16, #tpu.memory_space<vmem>>, %arg6: memref<32x32xbf16, #tpu.memory_space<vmem>>, %arg7: memref<16x32xbf16, #tpu.memory_space<vmem>>, %arg8: memref<32x32xbf16, #tpu.memory_space<vmem>>, %arg9: memref<8x32xf32, #tpu.memory_space<vmem>>) attributes {dimension_semantics = [#tpu.dimension_semantics<parallel>], iteration_bounds = array<i64: 2>, scalar_prefetch = 0 : i64, scratch_operands = 0 : i64, tpu.core_type = #tpu.core_type<tc>, window_params = [{transform_indices = @transform_0, window_bounds = array<i64: 8, 16>}, {transform_indices = @transform_1, window_bounds = array<i64: 8, 16>}, {pipeline_mode = #tpu.pipeline_mode<synchronous>, transform_indices = @transform_2, window_bounds = array<i64: 4, 32>}, {pipeline_mode = #tpu.pipeline_mode<synchronous>, transform_indices = @transform_3, window_bounds = array<i64: 16, 32>}, {pipeline_mode = #tpu.pipeline_mode<synchronous>, transform_indices = @transform_4, window_bounds = array<i64: 32, 32>}, {pipeline_mode = #tpu.pipeline_mode<synchronous>, transform_indices = @transform_5, window_bounds = array<i64: 32, 32>}, {pipeline_mode = #tpu.pipeline_mode<synchronous>, transform_indices = @transform_6, window_bounds = array<i64: 16, 32>}, {pipeline_mode = #tpu.pipeline_mode<synchronous>, transform_indices = @transform_7, window_bounds = array<i64: 32, 32>}, {transform_indices = @transform_8, window_bounds = array<i64: 8, 32>}]} {
    %c0 = arith.constant 0 : index
    %c0_0 = arith.constant 0 : index
    %0 = vector.load %arg1[%c0, %c0_0] : memref<8x16xbf16, #tpu.memory_space<vmem>>, vector<8x16xbf16>
    %c0_1 = arith.constant 0 : index
    %c0_2 = arith.constant 0 : index
    %1 = vector.load %arg2[%c0_1, %c0_2] : memref<8x16xbf16, #tpu.memory_space<vmem>>, vector<8x16xbf16>
    %c0_3 = arith.constant 0 : index
    %c0_4 = arith.constant 0 : index
    %2 = vector.load %arg4[%c0_3, %c0_4] : memref<16x32xbf16, #tpu.memory_space<vmem>>, vector<16x32xbf16>
    %cst = arith.constant dense<0.000000e+00> : vector<8x32xf32>
    %3 = tpu.matmul %0, %2, %cst {dimension_numbers = #tpu.dot_dimension_numbers<[1], [0], [0], [1], [0, 0, 1, 1], [], []>} : vector<8x16xbf16>, vector<16x32xbf16>, vector<8x32xf32> -> vector<8x32xf32>
    %c0_5 = arith.constant 0 : index
    %c0_6 = arith.constant 0 : index
    %4 = vector.load %arg3[%c0_5, %c0_6] : memref<4x32xf32, #tpu.memory_space<vmem>>, vector<1x32xf32>
    %5 = vector.broadcast %4 : vector<1x32xf32> to vector<8x32xf32>
    %6 = arith.addf %3, %5 : vector<8x32xf32>
    %cst_7 = arith.constant 0.000000e+00 : f32
    %7 = vector.broadcast %cst_7 : f32 to vector<8x32xf32>
    %8 = arith.maximumf %6, %7 : vector<8x32xf32>
    %9 = arith.truncf %8 : vector<8x32xf32> to vector<8x32xbf16>
    %c0_8 = arith.constant 0 : index
    %c0_9 = arith.constant 0 : index
    %10 = vector.load %arg5[%c0_8, %c0_9] : memref<32x32xbf16, #tpu.memory_space<vmem>>, vector<32x32xbf16>
    %cst_10 = arith.constant dense<0.000000e+00> : vector<8x32xf32>
    %11 = tpu.matmul %9, %10, %cst_10 {dimension_numbers = #tpu.dot_dimension_numbers<[1], [0], [0], [1], [0, 0, 1, 1], [], []>} : vector<8x32xbf16>, vector<32x32xbf16>, vector<8x32xf32> -> vector<8x32xf32>
    %c1 = arith.constant 1 : index
    %c0_11 = arith.constant 0 : index
    %12 = vector.load %arg3[%c1, %c0_11] : memref<4x32xf32, #tpu.memory_space<vmem>>, vector<1x32xf32>
    %13 = vector.broadcast %12 : vector<1x32xf32> to vector<8x32xf32>
    %14 = arith.addf %11, %13 : vector<8x32xf32>
    %cst_12 = arith.constant 0.000000e+00 : f32
    %15 = vector.broadcast %cst_12 : f32 to vector<8x32xf32>
    %16 = arith.maximumf %14, %15 : vector<8x32xf32>
    %17 = arith.truncf %16 : vector<8x32xf32> to vector<8x32xbf16>
    %c0_13 = arith.constant 0 : index
    %c0_14 = arith.constant 0 : index
    %18 = vector.load %arg6[%c0_13, %c0_14] : memref<32x32xbf16, #tpu.memory_space<vmem>>, vector<32x32xbf16>
    %cst_15 = arith.constant dense<0.000000e+00> : vector<8x32xf32>
    %19 = tpu.matmul %17, %18, %cst_15 {dimension_numbers = #tpu.dot_dimension_numbers<[1], [0], [0], [1], [0, 0, 1, 1], [], []>} : vector<8x32xbf16>, vector<32x32xbf16>, vector<8x32xf32> -> vector<8x32xf32>
    %c0_16 = arith.constant 0 : index
    %c0_17 = arith.constant 0 : index
    %20 = vector.load %arg7[%c0_16, %c0_17] : memref<16x32xbf16, #tpu.memory_space<vmem>>, vector<16x32xbf16>
    %cst_18 = arith.constant dense<0.000000e+00> : vector<8x32xf32>
    %21 = tpu.matmul %1, %20, %cst_18 {dimension_numbers = #tpu.dot_dimension_numbers<[1], [0], [0], [1], [0, 0, 1, 1], [], []>} : vector<8x16xbf16>, vector<16x32xbf16>, vector<8x32xf32> -> vector<8x32xf32>
    %22 = arith.addf %19, %21 : vector<8x32xf32>
    %c2 = arith.constant 2 : index
    %c0_19 = arith.constant 0 : index
    %23 = vector.load %arg3[%c2, %c0_19] : memref<4x32xf32, #tpu.memory_space<vmem>>, vector<1x32xf32>
    %24 = vector.broadcast %23 : vector<1x32xf32> to vector<8x32xf32>
    %25 = arith.addf %22, %24 : vector<8x32xf32>
    %cst_20 = arith.constant 0.000000e+00 : f32
    %26 = vector.broadcast %cst_20 : f32 to vector<8x32xf32>
    %27 = arith.maximumf %25, %26 : vector<8x32xf32>
    %28 = arith.truncf %27 : vector<8x32xf32> to vector<8x32xbf16>
    %c0_21 = arith.constant 0 : index
    %c0_22 = arith.constant 0 : index
    %29 = vector.load %arg8[%c0_21, %c0_22] : memref<32x32xbf16, #tpu.memory_space<vmem>>, vector<32x32xbf16>
    %cst_23 = arith.constant dense<0.000000e+00> : vector<8x32xf32>
    %30 = tpu.matmul %28, %29, %cst_23 {dimension_numbers = #tpu.dot_dimension_numbers<[1], [0], [0], [1], [0, 0, 1, 1], [], []>} : vector<8x32xbf16>, vector<32x32xbf16>, vector<8x32xf32> -> vector<8x32xf32>
    %c3 = arith.constant 3 : index
    %c0_24 = arith.constant 0 : index
    %31 = vector.load %arg3[%c3, %c0_24] : memref<4x32xf32, #tpu.memory_space<vmem>>, vector<1x32xf32>
    %32 = vector.broadcast %31 : vector<1x32xf32> to vector<8x32xf32>
    %33 = arith.addf %30, %32 : vector<8x32xf32>
    %cst_25 = arith.constant 0.000000e+00 : f32
    %34 = vector.broadcast %cst_25 : f32 to vector<8x32xf32>
    %35 = arith.maximumf %33, %34 : vector<8x32xf32>
    %c0_26 = arith.constant 0 : index
    %c0_27 = arith.constant 0 : index
    %36 = vector.load %arg9[%c0_26, %c0_27] : memref<8x32xf32, #tpu.memory_space<vmem>>, vector<8x32xf32>
    tpu.vector_store %arg9[%c0_26, %c0_27], %35 {strides = array<i32>} : memref<8x32xf32, #tpu.memory_space<vmem>>, vector<8x32xf32>,
    return
  }
  func.func @transform_0(%arg0: i32) -> (i32, i32) {
    %c0_i32 = arith.constant 0 : i32
    %c0_i32_0 = arith.constant 0 : i32
    return %arg0, %c0_i32 : i32, i32
  }
  func.func @transform_1(%arg0: i32) -> (i32, i32) {
    %c0_i32 = arith.constant 0 : i32
    %c0_i32_0 = arith.constant 0 : i32
    return %arg0, %c0_i32 : i32, i32
  }
  func.func @transform_2(%arg0: i32) -> (i32, i32) {
    %c0_i32 = arith.constant 0 : i32
    %c0_i32_0 = arith.constant 0 : i32
    %c0_i32_1 = arith.constant 0 : i32
    return %c0_i32, %c0_i32_0 : i32, i32
  }
  func.func @transform_3(%arg0: i32) -> (i32, i32) {
    %c0_i32 = arith.constant 0 : i32
    %c0_i32_0 = arith.constant 0 : i32
    %c0_i32_1 = arith.constant 0 : i32
    return %c0_i32, %c0_i32_0 : i32, i32
  }
  func.func @transform_4(%arg0: i32) -> (i32, i32) {
    %c0_i32 = arith.constant 0 : i32
    %c0_i32_0 = arith.constant 0 : i32
    %c0_i32_1 = arith.constant 0 : i32
    return %c0_i32, %c0_i32_0 : i32, i32
  }
  func.func @transform_5(%arg0: i32) -> (i32, i32) {
    %c0_i32 = arith.constant 0 : i32
    %c0_i32_0 = arith.constant 0 : i32
    %c0_i32_1 = arith.constant 0 : i32
    return %c0_i32, %c0_i32_0 : i32, i32
  }
  func.func @transform_6(%arg0: i32) -> (i32, i32) {
    %c0_i32 = arith.constant 0 : i32
    %c0_i32_0 = arith.constant 0 : i32
    %c0_i32_1 = arith.constant 0 : i32
    return %c0_i32, %c0_i32_0 : i32, i32
  }
  func.func @transform_7(%arg0: i32) -> (i32, i32) {
    %c0_i32 = arith.constant 0 : i32
    %c0_i32_0 = arith.constant 0 : i32
    %c0_i32_1 = arith.constant 0 : i32
    return %c0_i32, %c0_i32_0 : i32, i32
  }
  func.func @transform_8(%arg0: i32) -> (i32, i32) {
    %c0_i32 = arith.constant 0 : i32
    %c0_i32_0 = arith.constant 0 : i32
    return %arg0, %c0_i32 : i32, i32
  }
}

module attributes {stable_mosaic.version = 11 : i64} {
  func.func @_fused_mlp_kernel(%arg0: i32, %arg1: memref<8x16xbf16, #tpu.memory_space<vmem>>, %arg2: memref<8x16xbf16, #tpu.memory_space<vmem>>, %arg3: memref<4x32xf32, #tpu.memory_space<vmem>>, %arg4: memref<16x32xbf16, #tpu.memory_space<vmem>>, %arg5: memref<32x32xbf16, #tpu.memory_space<vmem>>, %arg6: memref<32x32xbf16, #tpu.memory_space<vmem>>, %arg7: memref<16x32xbf16, #tpu.memory_space<vmem>>, %arg8: memref<32x32xbf16, #tpu.memory_space<vmem>>, %arg9: memref<8x32xf32, #tpu.memory_space<vmem>>) attributes {dimension_semantics = [#tpu.dimension_semantics<parallel>], iteration_bounds = array<i64: 2>, scalar_prefetch = 0 : i64, scratch_operands = 0 : i64, tpu.core_type = #tpu.core_type<tc>, window_params = [{transform_indices = @transform_0, window_bounds = array<i64: 8, 16>}, {transform_indices = @transform_1, window_bounds = array<i64: 8, 16>}, {pipeline_mode = #tpu.pipeline_mode<synchronous>, transform_indices = @transform_2, window_bounds = array<i64: 4, 32>}, {pipeline_mode = #tpu.pipeline_mode<synchronous>, transform_indices = @transform_3, window_bounds = array<i64: 16, 32>}, {pipeline_mode = #tpu.pipeline_mode<synchronous>, transform_indices = @transform_4, window_bounds = array<i64: 32, 32>}, {pipeline_mode = #tpu.pipeline_mode<synchronous>, transform_indices = @transform_5, window_bounds = array<i64: 32, 32>}, {pipeline_mode = #tpu.pipeline_mode<synchronous>, transform_indices = @transform_6, window_bounds = array<i64: 16, 32>}, {pipeline_mode = #tpu.pipeline_mode<synchronous>, transform_indices = @transform_7, window_bounds = array<i64: 32, 32>}, {transform_indices = @transform_8, window_bounds = array<i64: 8, 32>}]} {
    %c0 = arith.constant 0 : index
    %c0_0 = arith.constant 0 : index
    %0 = vector.load %arg1[%c0, %c0_0] : memref<8x16xbf16, #tpu.memory_space<vmem>>, vector<8x16xbf16>
    %c0_1 = arith.constant 0 : index
    %c0_2 = arith.constant 0 : index
    %1 = vector.load %arg2[%c0_1, %c0_2] : memref<8x16xbf16, #tpu.memory_space<vmem>>, vector<8x16xbf16>
    %c0_3 = arith.constant 0 : index
    %c0_4 = arith.constant 0 : index
    %2 = vector.load %arg4[%c0_3, %c0_4] : memref<16x32xbf16, #tpu.memory_space<vmem>>, vector<16x32xbf16>
    %cst = arith.constant dense<0.000000e+00> : vector<8x32xf32>
    %3 = tpu.matmul %0, %2, %cst {dimension_numbers = #tpu.dot_dimension_numbers<[1], [0], [0], [1], [0, 0, 1, 1], [], []>} : vector<8x16xbf16>, vector<16x32xbf16>, vector<8x32xf32> -> vector<8x32xf32>
    %c0_5 = arith.constant 0 : index
    %c0_6 = arith.constant 0 : index
    %4 = vector.load %arg3[%c0_5, %c0_6] : memref<4x32xf32, #tpu.memory_space<vmem>>, vector<1x32xf32>
    %5 = vector.broadcast %4 : vector<1x32xf32> to vector<8x32xf32>
    %6 = arith.addf %3, %5 : vector<8x32xf32>
    %cst_7 = arith.constant 0.000000e+00 : f32
    %7 = vector.broadcast %cst_7 : f32 to vector<8x32xf32>
    %8 = arith.maximumf %6, %7 : vector<8x32xf32>
    %9 = arith.truncf %8 : vector<8x32xf32> to vector<8x32xbf16>
    %c0_8 = arith.constant 0 : index
    %c0_9 = arith.constant 0 : index
    %10 = vector.load %arg5[%c0_8, %c0_9] : memref<32x32xbf16, #tpu.memory_space<vmem>>, vector<32x32xbf16>
    %cst_10 = arith.constant dense<0.000000e+00> : vector<8x32xf32>
    %11 = tpu.matmul %9, %10, %cst_10 {dimension_numbers = #tpu.dot_dimension_numbers<[1], [0], [0], [1], [0, 0, 1, 1], [], []>} : vector<8x32xbf16>, vector<32x32xbf16>, vector<8x32xf32> -> vector<8x32xf32>
    %c1 = arith.constant 1 : index
    %c0_11 = arith.constant 0 : index
    %12 = vector.load %arg3[%c1, %c0_11] : memref<4x32xf32, #tpu.memory_space<vmem>>, vector<1x32xf32>
    %13 = vector.broadcast %12 : vector<1x32xf32> to vector<8x32xf32>
    %14 = arith.addf %11, %13 : vector<8x32xf32>
    %cst_12 = arith.constant 0.000000e+00 : f32
    %15 = vector.broadcast %cst_12 : f32 to vector<8x32xf32>
    %16 = arith.maximumf %14, %15 : vector<8x32xf32>
    %17 = arith.truncf %16 : vector<8x32xf32> to vector<8x32xbf16>
    %c0_13 = arith.constant 0 : index
    %c0_14 = arith.constant 0 : index
    %18 = vector.load %arg6[%c0_13, %c0_14] : memref<32x32xbf16, #tpu.memory_space<vmem>>, vector<32x32xbf16>
    %cst_15 = arith.constant dense<0.000000e+00> : vector<8x32xf32>
    %19 = tpu.matmul %17, %18, %cst_15 {dimension_numbers = #tpu.dot_dimension_numbers<[1], [0], [0], [1], [0, 0, 1, 1], [], []>} : vector<8x32xbf16>, vector<32x32xbf16>, vector<8x32xf32> -> vector<8x32xf32>
    %c0_16 = arith.constant 0 : index
    %c0_17 = arith.constant 0 : index
    %20 = vector.load %arg7[%c0_16, %c0_17] : memref<16x32xbf16, #tpu.memory_space<vmem>>, vector<16x32xbf16>
    %cst_18 = arith.constant dense<0.000000e+00> : vector<8x32xf32>
    %21 = tpu.matmul %1, %20, %cst_18 {dimension_numbers = #tpu.dot_dimension_numbers<[1], [0], [0], [1], [0, 0, 1, 1], [], []>} : vector<8x16xbf16>, vector<16x32xbf16>, vector<8x32xf32> -> vector<8x32xf32>
    %22 = arith.addf %19, %21 : vector<8x32xf32>
    %c2 = arith.constant 2 : index
    %c0_19 = arith.constant 0 : index
    %23 = vector.load %arg3[%c2, %c0_19] : memref<4x32xf32, #tpu.memory_space<vmem>>, vector<1x32xf32>
    %24 = vector.broadcast %23 : vector<1x32xf32> to vector<8x32xf32>
    %25 = arith.addf %22, %24 : vector<8x32xf32>
    %cst_20 = arith.constant 0.000000e+00 : f32
    %26 = vector.broadcast %cst_20 : f32 to vector<8x32xf32>
    %27 = arith.maximumf %25, %26 : vector<8x32xf32>
    %28 = arith.truncf %27 : vector<8x32xf32> to vector<8x32xbf16>
    %c0_21 = arith.constant 0 : index
    %c0_22 = arith.constant 0 : index
    %29 = vector.load %arg8[%c0_21, %c0_22] : memref<32x32xbf16, #tpu.memory_space<vmem>>, vector<32x32xbf16>
    %cst_23 = arith.constant dense<0.000000e+00> : vector<8x32xf32>
    %30 = tpu.matmul %28, %29, %cst_23 {dimension_numbers = #tpu.dot_dimension_numbers<[1], [0], [0], [1], [0, 0, 1, 1], [], []>} : vector<8x32xbf16>, vector<32x32xbf16>, vector<8x32xf32> -> vector<8x32xf32>
    %c3 = arith.constant 3 : index
    %c0_24 = arith.constant 0 : index
    %31 = vector.load %arg3[%c3, %c0_24] : memref<4x32xf32, #tpu.memory_space<vmem>>, vector<1x32xf32>
    %32 = vector.broadcast %31 : vector<1x32xf32> to vector<8x32xf32>
    %33 = arith.addf %30, %32 : vector<8x32xf32>
    %cst_25 = arith.constant 0.000000e+00 : f32
    %34 = vector.broadcast %cst_25 : f32 to vector<8x32xf32>
    %35 = arith.maximumf %33, %34 : vector<8x32xf32>
    %c0_26 = arith.constant 0 : index
    %c0_27 = arith.constant 0 : index
    %36 = vector.load %arg9[%c0_26, %c0_27] : memref<8x32xf32, #tpu.memory_space<vmem>>, vector<8x32xf32>
    tpu.vector_store %arg9[%c0_26, %c0_27], %35 {strides = array<i32>} : memref<8x32xf32, #tpu.memory_space<vmem>>, vector<8x32xf32>,
    return
  }
  func.func @transform_0(%arg0: i32) -> (i32, i32) {
    %c0_i32 = arith.constant 0 : i32
    %c0_i32_0 = arith.constant 0 : i32
    return %arg0, %c0_i32 : i32, i32
  }
  func.func @transform_1(%arg0: i32) -> (i32, i32) {
    %c0_i32 = arith.constant 0 : i32
    %c0_i32_0 = arith.constant 0 : i32
    return %arg0, %c0_i32 : i32, i32
  }
  func.func @transform_2(%arg0: i32) -> (i32, i32) {
    %c0_i32 = arith.constant 0 : i32
    %c0_i32_0 = arith.constant 0 : i32
    %c0_i32_1 = arith.constant 0 : i32
    return %c0_i32, %c0_i32_0 : i32, i32
  }
  func.func @transform_3(%arg0: i32) -> (i32, i32) {
    %c0_i32 = arith.constant 0 : i32
    %c0_i32_0 = arith.constant 0 : i32
    %c0_i32_1 = arith.constant 0 : i32
    return %c0_i32, %c0_i32_0 : i32, i32
  }
  func.func @transform_4(%arg0: i32) -> (i32, i32) {
    %c0_i32 = arith.constant 0 : i32
    %c0_i32_0 = arith.constant 0 : i32
    %c0_i32_1 = arith.constant 0 : i32
    return %c0_i32, %c0_i32_0 : i32, i32
  }
  func.func @transform_5(%arg0: i32) -> (i32, i32) {
    %c0_i32 = arith.constant 0 : i32
    %c0_i32_0 = arith.constant 0 : i32
    %c0_i32_1 = arith.constant 0 : i32
    return %c0_i32, %c0_i32_0 : i32, i32
  }
  func.func @transform_6(%arg0: i32) -> (i32, i32) {
    %c0_i32 = arith.constant 0 : i32
    %c0_i32_0 = arith.constant 0 : i32
    %c0_i32_1 = arith.constant 0 : i32
    return %c0_i32, %c0_i32_0 : i32, i32
  }
  func.func @transform_7(%arg0: i32) -> (i32, i32) {
    %c0_i32 = arith.constant 0 : i32
    %c0_i32_0 = arith.constant 0 : i32
    %c0_i32_1 = arith.constant 0 : i32
    return %c0_i32, %c0_i32_0 : i32, i32
  }
  func.func @transform_8(%arg0: i32) -> (i32, i32) {
    %c0_i32 = arith.constant 0 : i32
    %c0_i32_0 = arith.constant 0 : i32
    return %arg0, %c0_i32 : i32, i32
  }
}

</mosaic_0001>

<bundles_post_ra>
// kernel: tpu_custom_call.1
= control target key start
LH: loop header
LB: loop body
LE: loop exit
PB: predicated region body
PF: predicated region fallthrough
CT: control target
= control target key end

     0   :  { %s1797_s0 = inlined_call_operand.hbm [shape: bf16[16,16], index: 0, kind: input, shape index: {}]   ;;  %s1798_s1 = inlined_call_operand.hbm [shape: bf16[16,16], index: 1, kind: input, shape index: {}]   ;;  %s1799_s2 = inlined_call_operand.hbm [shape: f32[4,32], index: 2, kind: input, shape index: {}]   ;;  %s1800_s3 = inlined_call_operand.hbm [shape: bf16[16,32], index: 3, kind: input, shape index: {}]   ;;  %s1801_s4 = inlined_call_operand.hbm [shape: bf16[32,32], index: 4, kind: input, shape index: {}]   ;;  %s1802_s5 = inlined_call_operand.vmem [shape: bf16[32,32], index: 5, kind: input, shape index: {}]   ;;  %s1803_s6 = inlined_call_operand.hbm [shape: bf16[16,32], index: 6, kind: input, shape index: {}]   ;;  %s1804_s7 = inlined_call_operand.hbm [shape: bf16[32,32], index: 7, kind: input, shape index: {}]   ;;  %s1805_s8 = inlined_call_operand.hbm [shape: f32[16,32], index: 8, kind: output, shape index: {}]  }
   0x1   :  { %1810 = sst [smem:[#allocation21_spill]] %s1799_s2 }
   0x2   :  { %1811 = sst [smem:[#allocation22_spill]] %s1800_s3 }
   0x3   :  { %1812 = sst [smem:[#allocation23_spill]] %s1801_s4 }
   0x4   :  { %1813 = sst [smem:[#allocation24_spill]] %s1803_s6 }
   0x5   :  { %1814 = sst [smem:[#allocation25_spill]] %s1804_s7 }
   0x6   :  { %13 = vsyncpa [#allocation3], 0 }
   0x7   :  { %15 = vsyncpa [#allocation3 + $0x1], 0 }
   0x8   :  { %16 = vsyncpa [#allocation6], 0 }
   0x9   :  { %18 = vsyncpa [#allocation6 + $0x1], 0 }
   0xa   :  { %19 = vsyncpa [#allocation9], 0 }
   0xb   :  { %20 = vsyncpa [#allocation12], 0 }
   0xc   :  { %21 = vsyncpa [#allocation4], 0 }
   0xd   :  { %23 = vsyncpa [#allocation4 + $0x1], 0  ;;  %s1441_s27 = smov 0   ;;  %s1443_s28 = smov 0  }
   0xe   :  { %s1445_s29 = smov 0   ;;  %s1447_s30 = smov 0  }
   0xf LB: > { %s1384_s9 = smov [#allocation7]   ;;  %s1462_s11 = sadd.s32 4294967295, %s1382_s30   ;;  %s1382_s30 = sphi %s1447_s30, %s1842_s30   ;;  %s1378_s29 = sphi %s1445_s29, %s1841_s29   ;;  %s1374_s28 = sphi %s1443_s28, %s1840_s28   ;;  %s1370_s27 = sphi %s1441_s27, %s1839_s27  }
  0x10   : > { %s251_s10 = sshll.u32 %s1384_s9, 4  ;;  %p896_p0 = scmp.ge.s32.totalorder %s1382_s30, 1  ;;  %s252_s10 = int_to_ptr.vmem [resolvable:$true] %s251_s10 }
  0x11   : > { %p1806_p1 = scmp.eq.s32.totalorder %s1462_s11, 0  ;;  %p238_p2 = scmp.lt.s32.totalorder %s1382_s30, 3 }
  0x12   : > { %s1385_s13 = smov [#allocation8]   ;;  %s1386_s16 = smov [#allocation11]  }
  0x13   : > { %p1467_p3 = pnand %p896_p0, %p238_p2  ;;  %s261_s14 = sshll.u32 %s1385_s13, 4  ;;  %s1474_s14 = int_to_ptr.vmem [resolvable:$true] %s261_s14 }
  0x14   : > { %s290_s17 = sshll.u32 %s1386_s16, 4  ;;  %s1817_s2 = sld [smem:[#allocation21_spill]]  ;;  %s1482_s17 = int_to_ptr.vmem [resolvable:$true] %s290_s17 }
  0x15   : > { %s1815_s12 = scalar_select %p1467_p3, 1, 0 }
  0x16   : > { %p1012_p5 = pneg %p1467_p3 }
  0x18   : > { %p1478_p6 = pnand %p1012_p5, %p1806_p1 }
  0x1a   : > { %s1100_s20 = scalar_lea.hbm %s1817_s2, 64  ;;  %p1492_p8 = pneg %p1478_p6 }
  0x1b   : > { %p1101_p7 = scmp.ne.s32.totalorder %s1817_s2, %s1100_s20  ;;  %p1107_p11 = scmp.lt.u32.totalorder %s1100_s20, %s1817_s2 }
  0x1d   : > { %p1103_p9 = pnand %p1492_p8, %p1101_p7 }
  0x1f   : > { %p1104_p10 = pneg %p1103_p9 }
  0x21   : > { %p1109_p12 = pnand %p1107_p11, %p1104_p10 }
  0x23   : > { %1112 = shalt.err (!%p1109_p12)
}
  0x24   : > { %s1113_s26 = scalar_lea.vmem %s252_s10, 64  ;;  %p1121_p5 = scmp.lt.s32.totalorder %s252_s10, %s252_s10 }
  0x25   : > { %p1114_p13 = scmp.ne.s32.totalorder %s252_s10, %s1113_s26  ;;  %p1122_p4 = scmp.lt.s32.totalorder %s1113_s26, %s1113_s26 }
  0x27   : > { %p1116_p0 = pnand %p1114_p13, %p1492_p8  ;;  %p1123_p1 = por %p1122_p4, %p1121_p5 }
  0x29   : > { %p1117_p2 = pneg %p1116_p0 }
  0x2b   : > { %p1124_p3 = pnand %p1123_p1, %p1117_p2 }
  0x2d   : > { %1127 = shalt.err (!%p1124_p3)
}
  0x2e   : > { %1015 = dma.hbm_to_vmem [thread:$0]  (!%p1478_p6), %s1817_s2, 64, %s252_s10, [#allocation6]  }
  0x2f   : > { %s1819_s3 = sld [smem:[#allocation22_spill]] }
  0x35   : > { %s1128_s19 = scalar_lea.hbm %s1819_s3, 128 }
  0x36   : > { %p1129_p7 = scmp.ne.s32.totalorder %s1819_s3, %s1128_s19  ;;  %p1135_p1 = scmp.lt.u32.totalorder %s1128_s19, %s1819_s3 }
  0x38   : > { %p1131_p9 = pnand %p1129_p7, %p1492_p8 }
  0x3a   : > { %p1132_p4 = pneg %p1131_p9 }
  0x3c   : > { %p1137_p3 = pnand %p1135_p1, %p1132_p4 }
  0x3e   : > { %1140 = shalt.err (!%p1137_p3)
}
  0x3f   : > { %s1141_s10 = scalar_lea.vmem %s1474_s14, 128  ;;  %p1149_p13 = scmp.lt.s32.totalorder %s1474_s14, %s1474_s14 }
  0x40   : > { %p1142_p10 = scmp.ne.s32.totalorder %s1474_s14, %s1141_s10  ;;  %p1150_p0 = scmp.lt.s32.totalorder %s1141_s10, %s1141_s10 }
  0x42   : > { %p1144_p11 = pnand %p1142_p10, %p1492_p8  ;;  %p1151_p2 = por %p1150_p0, %p1149_p13 }
  0x44   : > { %p1145_p12 = pneg %p1144_p11 }
  0x46   : > { %p1152_p5 = pnand %p1151_p2, %p1145_p12 }
  0x48   : > { %1155 = shalt.err (!%p1152_p5)
}
  0x49   : > { %s1387_s25 = smov 64   ;;  %s1388_s26 = smov 4  }
  0x4a   : > { %1018 = dma.hbm_to_vmem [thread:$0]  (!%p1478_p6), %s1819_s3, 128, %s1474_s14, [#allocation9], %s1387_s25, %s1387_s25, %s1388_s26  }
  0x4b   : > { %s1820_s6 = sld [smem:[#allocation24_spill]] }
  0x51   : > { %s1156_s19 = scalar_lea.hbm %s1820_s6, 128 }
  0x52   : > { %p1157_p7 = scmp.ne.s32.totalorder %s1820_s6, %s1156_s19  ;;  %p1163_p1 = scmp.lt.u32.totalorder %s1156_s19, %s1820_s6 }
  0x54   : > { %p1159_p9 = pnand %p1157_p7, %p1492_p8 }
  0x56   : > { %p1160_p4 = pneg %p1159_p9 }
  0x58   : > { %p1165_p3 = pnand %p1163_p1, %p1160_p4 }
  0x5a   : > { %1168 = shalt.err (!%p1165_p3)
}
  0x5b   : > { %s1169_s14 = scalar_lea.vmem %s1482_s17, 128  ;;  %p1177_p13 = scmp.lt.s32.totalorder %s1482_s17, %s1482_s17 }
  0x5c   : > { %p1170_p10 = scmp.ne.s32.totalorder %s1482_s17, %s1169_s14  ;;  %p1178_p0 = scmp.lt.s32.totalorder %s1169_s14, %s1169_s14 }
  0x5e   : > { %p1172_p11 = pnand %p1170_p10, %p1492_p8  ;;  %p1179_p2 = por %p1178_p0, %p1177_p13 }
  0x60   : > { %p1173_p12 = pneg %p1172_p11 }
  0x62   : > { %p1180_p5 = pnand %p1179_p2, %p1173_p12 }
  0x64   : > { %1183 = shalt.err (!%p1180_p5)
}
  0x65   : > { %1024 = dma.hbm_to_vmem [thread:$0]  (!%p1478_p6), %s1820_s6, 128, %s1482_s17, [#allocation12], %s1387_s25, %s1387_s25, %s1388_s26  }
  0x66   : > { %s1389_s13 = smov [#allocation10]   ;;  %s1390_s18 = smov [#allocation13]  }
  0x67   : > { %s274_s16 = sshll.u32 %s1389_s13, 4  ;;  %s303_s19 = sshll.u32 %s1390_s18, 4  ;;  %s275_s16 = int_to_ptr.vmem [resolvable:$true] %s274_s16  ;;  %s304_s19 = int_to_ptr.vmem [resolvable:$true] %s303_s19 }
  0x68   : > { %s1821_s4 = sld [smem:[#allocation23_spill]] }
  0x6e   : > { %s1184_s22 = scalar_lea.hbm %s1821_s4, 256 }
  0x6f   : > { %p1185_p7 = scmp.ne.s32.totalorder %s1821_s4, %s1184_s22  ;;  %p1191_p1 = scmp.lt.u32.totalorder %s1184_s22, %s1821_s4 }
  0x71   : > { %p1187_p9 = pnand %p1185_p7, %p1492_p8 }
  0x73   : > { %p1188_p4 = pneg %p1187_p9 }
  0x75   : > { %p1193_p3 = pnand %p1191_p1, %p1188_p4 }
  0x77   : > { %1196 = shalt.err (!%p1193_p3)
}
  0x78   : > { %s1197_s17 = scalar_lea.vmem %s275_s16, 256  ;;  %p1205_p13 = scmp.lt.s32.totalorder %s275_s16, %s275_s16 }
  0x79   : > { %p1198_p10 = scmp.ne.s32.totalorder %s275_s16, %s1197_s17  ;;  %p1206_p0 = scmp.lt.s32.totalorder %s1197_s17, %s1197_s17 }
  0x7b   : > { %p1200_p11 = pnand %p1198_p10, %p1492_p8  ;;  %p1207_p2 = por %p1206_p0, %p1205_p13 }
  0x7d   : > { %p1201_p12 = pneg %p1200_p11 }
  0x7f   : > { %p1208_p5 = pnand %p1207_p2, %p1201_p12 }
  0x81   : > { %1211 = shalt.err (!%p1208_p5)
}
  0x82   : > { %1021 = dma.hbm_to_vmem [thread:$0]  (!%p1478_p6), %s1821_s4, 256, %s275_s16, [#allocation9], %s1387_s25, %s1387_s25, %s1388_s26  }
  0x83   : > { %s1822_s7 = sld [smem:[#allocation25_spill]] }
  0x89   : > { %s1212_s20 = scalar_lea.hbm %s1822_s7, 256 }
  0x8a   : > { %p1213_p7 = scmp.ne.s32.totalorder %s1822_s7, %s1212_s20  ;;  %p1219_p1 = scmp.lt.u32.totalorder %s1212_s20, %s1822_s7 }
  0x8c   : > { %p1215_p9 = pnand %p1213_p7, %p1492_p8 }
  0x8e   : > { %p1216_p4 = pneg %p1215_p9 }
  0x90   : > { %p1221_p3 = pnand %p1219_p1, %p1216_p4 }
  0x92   : > { %1224 = shalt.err (!%p1221_p3)
}
  0x93   : > { %s1225_s10 = scalar_lea.vmem %s304_s19, 256  ;;  %p1233_p13 = scmp.lt.s32.totalorder %s304_s19, %s304_s19 }
  0x94   : > { %p1226_p10 = scmp.ne.s32.totalorder %s304_s19, %s1225_s10  ;;  %p1234_p0 = scmp.lt.s32.totalorder %s1225_s10, %s1225_s10 }
  0x96   : > { %p1228_p11 = pnand %p1226_p10, %p1492_p8  ;;  %p1235_p2 = por %p1234_p0, %p1233_p13 }
  0x98   : > { %p1229_p12 = pneg %p1228_p11 }
  0x9a   : > { %p1236_p5 = pnand %p1235_p2, %p1229_p12 }
  0x9c   : > { %1239 = shalt.err (!%p1236_p5)
}
  0x9d   : > { %1027 = dma.hbm_to_vmem [thread:$0]  (!%p1478_p6), %s1822_s7, 256, %s304_s19, [#allocation12], %s1387_s25, %s1387_s25, %s1388_s26  }
  0x9e   : > { %s895_s15 = sadd.s32 4294967294, %s1382_s30   ;;  %s1604_s23 = sadd.s32 1, %s1382_s30  }
  0x9f   : > { %s36_s2 = sadd.s32 1, %s1378_s29  ;;  %s33_s9 = ssub.s32 %s1382_s30, %s1604_s23 }
  0xa0   : > { %p43_p8 = scmp.ne.s32.totalorder %s1378_s29, %s1374_s28  ;;  %p34_p7 = scmp.eq.s32.totalorder %s33_s9, 0 }
  0xa1   : > { %p44_p9 = scmp.eq.s32.totalorder %s1382_s30, 0  ;;  %p49_p4 = scmp.ne.s32.totalorder %s1374_s28, %s1370_s27 }
  0xa2   : > { %p225_p1 = scmp.eq.s32.totalorder %s1462_s11, 1  ;;  %p1823_p10 = scmp.eq.s32.totalorder %s1462_s11, 0 }
  0xa3   : > { %s1616_s13 = scalar_select %p34_p7, %s1378_s29, %s36_s2  }
  0xa4   : > { %p45_p3 = por %p44_p9, %p43_p8  ;;  %p1620_p11 = por %p1823_p10, %p49_p4 }
  0xa5   : > { %p1624_p6 = por %p225_p1, %p43_p8  ;;  %p231_p12 = scmp.eq.s32.totalorder %s895_s15, 1 }
  0xa6   : > { %s1824_s18 = scalar_select %p1620_p11, 1, 0 }
  0xa7   : > { %s1825_s25 = scalar_select %p1624_p6, 1, 0 }
  0xa8   : > { %p1044_p13 = scmp.lt.s32.totalorder %s1382_s30, 2  ;;  %s317_s26 = sand.u32 1, %s1378_s29  }
  0xa9   : > { %p1630_p0 = por %p231_p12, %p49_p4  ;;  %s1634_s20 = sshll.u32 %s317_s26, 2 }
  0xaa   : > { %s904_s21 = sshll.u32 %s1382_s30, 6  ;;  %s321_s10 = scalar_lea.vmem [#allocation2], %s1634_s20 }
  0xab   : > { %s1826_s19 = scalar_select %p1630_p0, 1, 0 }
  0xac   : > { %s1640_s14 = scalar_lea.hbm %s1797_s0, %s904_s21  ;;  %s328_s16 = sshll.u32 %s321_s10, 4  ;;  %s1647_s16 = int_to_ptr.vmem [resolvable:$true] %s328_s16 }
  0xad   : > { %p1643_p2 = pnand %p1044_p13, %p45_p3  ;;  %s1652_s9 = scalar_lea.hbm %s1798_s1, %s904_s21 }
  0xae   : > { %s318_s22 = scalar_lea.sflag [#allocation3], %s317_s26  ;;  %s1240_s24 = scalar_lea.hbm %s1640_s14, 64 }
  0xaf   : > { %p1241_p5 = scmp.ne.s32.totalorder %s1640_s14, %s1240_s24  ;;  %p1242_p8 = pneg %p1643_p2 }
  0xb0   : > { %s1245_s4 = scalar_lea.hbm %s1797_s0, 128  ;;  %p1246_p4 = scmp.lt.u32.totalorder %s1640_s14, %s1797_s0 }
  0xb1   : > { %p1243_p7 = pnand %p1242_p8, %p1241_p5  ;;  %p1247_p1 = scmp.lt.u32.totalorder %s1245_s4, %s1240_s24 }
  0xb2   : > { %p1249_p10 = scmp.lt.u32.totalorder %s1240_s24, %s1640_s14 }
  0xb3   : > { %p1244_p9 = pneg %p1243_p7  ;;  %p1248_p3 = por %p1247_p1, %p1246_p4 }
  0xb5   : > { %p1250_p12 = por %p1249_p10, %p1248_p3 }
  0xb7   : > { %p1251_p13 = pnand %p1250_p12, %p1244_p9 }
  0xb9   : > { %1254 = shalt.err (!%p1251_p13)
}
  0xba   : > { %s1255_s26 = scalar_lea.vmem %s1647_s16, 64  ;;  %s1391_s3 = smov [#allocation2]  }
  0xbb   : > { %p1256_p5 = scmp.ne.s32.totalorder %s1647_s16, %s1255_s26  ;;  %s1260_s21 = sshll.u32 %s1391_s3, 4  ;;  %s1261_s21 = int_to_ptr.vmem [resolvable:$false] %s1260_s21 }
  0xbc   : > { %s1262_s6 = scalar_lea.vmem %s1261_s21, 128  ;;  %p1263_p6 = scmp.lt.s32.totalorder %s1647_s16, %s1261_s21 }
  0xbd   : > { %p1258_p7 = pnand %p1256_p5, %p1242_p8  ;;  %p1264_p4 = scmp.lt.s32.totalorder %s1262_s6, %s1255_s26 }
  0xbf   : > { %p1259_p0 = pneg %p1258_p7  ;;  %p1265_p1 = por %p1264_p4, %p1263_p6 }
  0xc1   : > { %p1266_p3 = pnand %p1265_p1, %p1259_p0 }
  0xc3   : > { %1269 = shalt.err (!%p1266_p3)
}
  0xc4   : > { %1031 = dma.hbm_to_vmem [thread:$0]  (!%p1643_p2), %s1640_s14, 64, %s1647_s16, %s318_s22  }
  0xc5   : > { %s335_s4 = sand.u32 1, %s1382_s30   ;;  %s339_s7 = scalar_lea.vmem [#allocation5], %s1634_s20 }
  0xc6   : > { %s346_s15 = sshll.u32 %s339_s7, 4  ;;  %s336_s2 = scalar_lea.sflag [#allocation6], %s335_s4  ;;  %s347_s15 = int_to_ptr.vmem [resolvable:$true] %s346_s15 }
  0xc7   : > { %s1270_s24 = scalar_lea.hbm %s1652_s9, 64  ;;  %s1275_s3 = scalar_lea.hbm %s1798_s1, 128 }
  0xc8   : > { %p1271_p6 = scmp.ne.s32.totalorder %s1652_s9, %s1270_s24  ;;  %p1276_p10 = scmp.lt.u32.totalorder %s1652_s9, %s1798_s1 }
  0xc9   : > { %p1277_p12 = scmp.lt.u32.totalorder %s1275_s3, %s1270_s24  ;;  %p1279_p5 = scmp.lt.u32.totalorder %s1270_s24, %s1652_s9 }
  0xca   : > { %p1273_p0 = pnand %p1271_p6, %p1242_p8 }
  0xcb   : > { %p1278_p13 = por %p1277_p12, %p1276_p10 }
  0xcc   : > { %p1274_p9 = pneg %p1273_p0 }
  0xcd   : > { %p1280_p7 = por %p1279_p5, %p1278_p13 }
  0xcf   : > { %p1281_p4 = pnand %p1280_p7, %p1274_p9 }
  0xd1   : > { %1284 = shalt.err (!%p1281_p4)
}
  0xd2   : > { %s1285_s20 = scalar_lea.vmem %s347_s15, 64  ;;  %s1392_s14 = smov [#allocation5]  }
  0xd3   : > { %p1286_p1 = scmp.ne.s32.totalorder %s347_s15, %s1285_s20  ;;  %s1290_s16 = sshll.u32 %s1392_s14, 4  ;;  %s1291_s16 = int_to_ptr.vmem [resolvable:$false] %s1290_s16 }
  0xd4   : > { %s1292_s22 = scalar_lea.vmem %s1291_s16, 128  ;;  %p1293_p0 = scmp.lt.s32.totalorder %s347_s15, %s1291_s16 }
  0xd5   : > { %p1288_p3 = pnand %p1286_p1, %p1242_p8  ;;  %p1294_p11 = scmp.lt.s32.totalorder %s1292_s22, %s1285_s20 }
  0xd7   : > { %p1289_p6 = pneg %p1288_p3  ;;  %p1295_p10 = por %p1294_p11, %p1293_p0 }
  0xd9   : > { %p1296_p12 = pnand %p1295_p10, %p1289_p6 }
  0xdb   : > { %1299 = shalt.err (!%p1296_p12)
}
  0xdc   : > { %1034 = dma.hbm_to_vmem [thread:$0]  (!%p1643_p2), %s1652_s9, 64, %s347_s15, %s336_s2  }
  0xdd   : > { %p1828_p9 = scmp.ne.s32.totalorder %s1815_s12, 0 }
  0xde   : > { %s1703_s4 = sand.u32 (!%p1828_p9), 1, %s1374_s28   ;;  %p1829_p8 = scmp.ne.s32.totalorder (!%p1828_p9), %s1824_s18, 0 }
  0xdf   : > { %355 = sbr.rel (%p1828_p9) target bundleno = 1136 (0x470), region = 52  ;;  %s908_s7 = sshll.u32 (!%p1828_p9), %s1703_s4, 2 }
  0xe0   : > { %s358_s24 = scalar_lea.sflag (!%p1828_p9), [#allocation3], %s1703_s4  ;;  %s361_s10 = scalar_lea.vmem (!%p1828_p9), [#allocation2], %s908_s7 }
  0xe6   : > { %1345 = dma.done.wait (%p1829_p8), %s358_s24, 64  }
  0xe7   : > { %1347 = vsyncadd (%p1829_p8), %s358_s24, 4294967232  ;;  %s366_s17 = sand.u32 1, %s1462_s11   ;;  %s1712_s12 = scalar_lea.vmem [#allocation5], %s908_s7 }
  0xe8   : > { %s367_s9 = scalar_lea.sflag [#allocation6], %s366_s17 }
  0xe9   : > { %1349 = dma.done.wait (%p1829_p8), %s367_s9, 64  }
  0xea   : > { %1351 = vsyncadd (%p1829_p8), %s367_s9, 4294967232  ;;  %p1830_p11 = scmp.eq.s32.totalorder %s1462_s11, 0 }
  0xec   : > { %1353 = dma.done.wait (%p1830_p11), [#allocation6], 64   ;;  %p1831_p2 = pmov %p1830_p11 }
  0xee   : > { %1355 = vsyncadd (%p1831_p2), [#allocation6], 4294967232  ;;  %p1832_p13 = pmov %p1831_p2 }
  0xef   : > { %p1833_p5 = pmov %p1831_p2 }
  0xf0   : > { %1357 = dma.done.wait (%p1832_p13), [#allocation9], 384  }
  0xf1   : > { %1359 = vsyncadd (%p1833_p5), [#allocation9], 4294966912  ;;  %p1834_p7 = pmov %p1831_p2 }
  0xf2   : > { %p1835_p4 = pmov %p1831_p2 }
  0xf3   : > { %1361 = dma.done.wait (%p1834_p7), [#allocation12], 384  }
  0xf4   : > { %1363 = vsyncadd (%p1835_p4), [#allocation12], 4294966912  ;;  %v1393_v0 = vmov 0.0   ;;  %vm1394_vm0 = vmmov 0   ;;  %v1092_v1 = vld [vmem:[#allocation8] sm:$0xff]   ;;  %vm444_vm1 = vcmask 130048  }
  0xf5   : > { %950 = vmatprep.subr.bf16.mxu0 %v1393_v0  ;;  %952 = vmatprep.mubr.msk.bf16.mxu0 %vm1394_vm0, %v1393_v0  ;;  %v429_v2 = vld [vmem:[%s361_s10] sm:$0xf]  ;;  %v1095_v5 = vld [vmem:[#allocation11] sm:$0xff]   ;;  %vm511_vm2 = vcmask 261120   ;;  %v1097_v15 = vld [vmem:[%s1802_s5 + $0x8] sm:$0xff]   ;;  %s915_s3 = sshll.u32 %s1703_s4, 3 }
  0xf6   : > { %956 = vmatprep.subr.bf16.mxu1 %v1393_v0  ;;  %960 = vmatprep.mubr.msk.bf16.mxu1 %vm1394_vm0, %v1393_v0  ;;  %v1093_v3 = vld [vmem:[#allocation10] sm:$0xff]   ;;  %v1094_v4 = vld [vmem:[#allocation10 + $0x8] sm:$0xff]   ;;  %v916_v6 = vld [vmem:[#allocation7] ss:$0 sm:$0xff]  ;;  %s934_s21 = sshll.u32 %s1462_s11, 7  ;;  %s427_s6 = scalar_lea.vmem [#allocation14], %s915_s3 }
  0xf7   : > { %951 = vmatpush3.bf16.msra.mxu0 %v1092_v1  ;;  %957 = vmatpush3.bf16.msra.mxu1 %v1093_v3  ;;  %v1096_v13 = vld [vmem:[%s1802_s5] sm:$0xff]   ;;  %v430_v16 = vld [vmem:[%s1712_s12] sm:$0xf]  ;;  %v1099_v30 = vld [vmem:[#allocation13 + $0x8] sm:$0xff]   ;;  %s755_s20 = sshll.u32 %s427_s6, 4  ;;  %s1752_s22 = scalar_lea.hbm %s1805_s8, %s934_s21  ;;  %s1754_s20 = int_to_ptr.vmem [resolvable:$true] %s755_s20 }
  0xf8   : > { %964 = vmatprep.subr.bf16.mxu0 %v1393_v0  ;;  %958 = vmatprep.subr.bf16.mxu1 %v1393_v0  ;;  %v919_v17 = vld [vmem:[#allocation7 + $0x1] ss:$0 sm:$0xff]  ;;  %v1098_v29 = vld [vmem:[#allocation13] sm:$0xff]   ;;  %v928_v32 = vld [vmem:[#allocation7 + $0x2] ss:$0 sm:$0xff]  ;;  %s742_s11 = scalar_lea.sflag [#allocation4], %s1703_s4 }
  0xf9   : > { %v929_v40 = vld [vmem:[#allocation7 + $0x3] ss:$0 sm:$0xff]  ;;  %s1300_s7 = scalar_lea.vmem %s1754_s20, 128  ;;  %p1836_p3 = scmp.ne.s32.totalorder %s1825_s25, 0 }
  0xfa   : > { %953 = vmatmul.mubr.msk.bf16.vlgmr.msra.gmra.mrb[0].mxu0 %vm444_vm1, %v429_v2  ;;  %p1301_p1 = scmp.ne.s32.totalorder %s1754_s20, %s1300_s7  ;;  %s1395_s24 = smov [#allocation14]  }
  0xfb   : > { %966 = vmatprep.mubr.msk.bf16.mxu0 %vm1394_vm0, %v1393_v0  ;;  %959 = vmatpush3.bf16.msra.mxu1 %v1094_v4  ;;  %s1304_s10 = sshll.u32 %s1395_s24, 4  ;;  %s1305_s10 = int_to_ptr.vmem [resolvable:$false] %s1304_s10 }
  0xfc   : > { %970 = vmatprep.subr.bf16.mxu1 %v1393_v0  ;;  %965 = vmatpush3.bf16.msra.mxu0 %v1095_v5  ;;  %p1302_p6 = pnand %p1301_p1, %p1836_p3  ;;  %s1306_s17 = scalar_lea.vmem %s1305_s10, 256 }
  0xfd   : > { %978 = vmatprep.subr.bf16.mxu0 %v1393_v0  ;;  %p1307_p10 = scmp.lt.s32.totalorder %s1754_s20, %s1305_s10  ;;  %p1308_p12 = scmp.lt.s32.totalorder %s1306_s17, %s1300_s7 }
  0xfe   : > { %p1303_p0 = pneg %p1302_p6 }
  0xff   : > { %p1309_p9 = por %p1308_p12, %p1307_p10 }
 0x101   : > { %p1310_p8 = pnand %p1309_p9, %p1303_p0 }
 0x102   : > { %967 = vmatmul.mubr.msk.bf16.vlgmr.msra.gmra.mrb[4].mxu0 %vm444_vm1, %v430_v16 }
 0x103   : > { %982 = vmatprep.mubr.msk.bf16.mxu0 %vm1394_vm0, %v1393_v0  ;;  %979 = vmatpush3.bf16.msra.mxu0 %v1098_v29 }
 0x104   : > { %980 = vmatprep.subr.bf16.mxu0 %v1393_v0 }
 0x107   : > { %981 = vmatpush3.bf16.msra.mxu0 %v1099_v30 }
 0x1cd   : > { %v482_v7 = vpop.f32.mrb[0].mxu0 }
 0x1ce   : > { %v483_v8 = vadd.f32 %v916_v6, %v482_v7  ;;  %v954_v9 = vpop.f32.mrb[1].mxu0 }
 0x1cf   : > { %v485_v10 = vpop.f32.mrb[2].mxu0 }
 0x1d0   : > { %v488_v11 = vmax.f32 %v483_v8, 0.0  ;;  %v955_v12 = vpop.f32.mrb[3].mxu0 }
 0x1d2   : > { %v489_v14 = vpack.c.bf16 %v488_v11, %v488_v11 }
 0x1d4   : > { %961 = vmatmul.mubr.msk.bf16.vlgmr.msra.gmra.mrb[0].mxu1 %vm511_vm2, %v489_v14 }
 0x1d5   : > { %971 = vmatpush3.bf16.msra.mxu1 %v1096_v13  ;;  %974 = vmatprep.mubr.msk.bf16.mxu1 %vm1394_vm0, %v1393_v0  ;;  %v606_v25 = vpop.f32.mrb[4].mxu0 }
 0x1d6   : > { %972 = vmatprep.subr.bf16.mxu1 %v1393_v0  ;;  %v968_v26 = vpop.f32.mrb[5].mxu0 }
 0x1d7   : > { %v609_v27 = vpop.f32.mrb[6].mxu0 }
 0x1d8   : > { %v969_v28 = vpop.f32.mrb[7].mxu0 }
 0x1d9   : > { %973 = vmatpush3.bf16.msra.mxu1 %v1097_v15 }
 0x2a7   : > { %v549_v18 = vpop.f32.mrb[0].mxu1 }
 0x2a8   : > { %v550_v19 = vadd.f32 %v919_v17, %v549_v18  ;;  %v962_v20 = vpop.f32.mrb[1].mxu1 }
 0x2a9   : > { %v552_v21 = vpop.f32.mrb[2].mxu1 }
 0x2aa   : > { %v555_v22 = vmax.f32 %v550_v19, 0.0  ;;  %v963_v23 = vpop.f32.mrb[3].mxu1 }
 0x2ac   : > { %v556_v24 = vpack.c.bf16 %v555_v22, %v555_v22 }
 0x2ae   : > { %975 = vmatmul.mubr.msk.bf16.vlgmr.msra.gmra.mrb[4].mxu1 %vm511_vm2, %v556_v24 }
 0x381   : > { %v661_v31 = vpop.f32.mrb[4].mxu1 }
 0x382   : > { %v662_v33 = vadd.f32 %v661_v31, %v606_v25  ;;  %v976_v34 = vpop.f32.mrb[5].mxu1 }
 0x383   : > { %v664_v35 = vpop.f32.mrb[6].mxu1 }
 0x384   : > { %v672_v36 = vadd.f32 %v928_v32, %v662_v33  ;;  %v977_v37 = vpop.f32.mrb[7].mxu1 }
 0x386   : > { %v673_v38 = vmax.f32 %v672_v36, 0.0 }
 0x388   : > { %v674_v39 = vpack.c.bf16 %v673_v38, %v673_v38 }
 0x38a   : > { %983 = vmatmul.mubr.msk.bf16.vlgmr.msra.gmra.mrb[8].mxu0 %vm511_vm2, %v674_v39 }
 0x45d   : > { %v733_v41 = vpop.f32.mrb[8].mxu0 }
 0x45e   : > { %v734_v42 = vadd.f32 %v929_v40, %v733_v41  ;;  %v984_v43 = vpop.f32.mrb[9].mxu0 }
 0x45f   : > { %v736_v44 = vpop.f32.mrb[10].mxu0 }
 0x460   : > { %v739_v45 = vmax.f32 %v734_v42, 0.0  ;;  %v985_v46 = vpop.f32.mrb[11].mxu0 }
 0x462   : > { %740 = vst.msk [vmem:[%s427_s6] sm:$0xff] %vm511_vm2, %v739_v45 }
 0x463   : > { %1313 = shalt.err (!%p1310_p8)
}
 0x464   : > { %s1314_s4 = scalar_lea.hbm %s1752_s22, 128  ;;  %s1318_s18 = scalar_lea.hbm %s1805_s8, 256 }
 0x465   : > { %p1315_p11 = scmp.ne.s32.totalorder %s1752_s22, %s1314_s4  ;;  %p1319_p5 = scmp.lt.u32.totalorder %s1752_s22, %s1805_s8 }
 0x466   : > { %p1320_p7 = scmp.lt.u32.totalorder %s1318_s18, %s1314_s4  ;;  %p1322_p1 = scmp.lt.u32.totalorder %s1314_s4, %s1752_s22 }
 0x467   : > { %p1316_p2 = pnand %p1315_p11, %p1836_p3 }
 0x468   : > { %p1321_p4 = por %p1320_p7, %p1319_p5 }
 0x469   : > { %p1317_p13 = pneg %p1316_p2 }
 0x46a   : > { %p1323_p6 = por %p1322_p1, %p1321_p4 }
 0x46c   : > { %p1324_p0 = pnand %p1323_p6, %p1317_p13 }
 0x46e   : > { %1327 = shalt.err (!%p1324_p0)
}
 0x46f   : > { %1010 = dma.vmem_to_hbm [thread:$0]  (%p1836_p3), %s1754_s20, 128, %s1752_s22, %s742_s11  }
 0x470 PF: > { %s767_s26 = sand.u32 1, %s1370_s27   ;;  %p1837_p10 = scmp.ne.s32.totalorder %s1826_s19, 0 }
 0x471   : > { %p1838_p12 = scmp.ge.s32.totalorder %s1382_s30, 2  ;;  %s768_s3 = scalar_lea.sflag [#allocation4], %s767_s26 }
 0x473   : > { %p1036_p9 = pnand %p1838_p12, %p1837_p10 }
 0x475   : > { %1365 = dma.done.wait (!%p1036_p9), %s768_s3, 128  }
 0x476   : > { %1367 = vsyncadd (!%p1036_p9), %s768_s3, 4294967168  ;;  %p26_p8 = scmp.ge.s32.totalorder %s1604_s23, 4   ;;  %s1839_s27 = smov %s1374_s28 }
 0x477   : > { %s1840_s28 = smov %s1378_s29  ;;  %s1841_s29 = smov %s1616_s13 }
 0x478   : > { %s1842_s30 = smov %s1604_s23  ;;  %28 = sbr.rel (!%p26_p8) target bundleno = 15 (0xf), region = 130 }
 0x47f   :  { %773 = vsyncpa [#allocation3], 1 }
 0x480   :  { %775 = vsyncpa [#allocation3 + $0x1], 1 }
 0x481   :  { %776 = vsyncpa [#allocation6], 1 }
 0x482   :  { %778 = vsyncpa [#allocation6 + $0x1], 1 }
 0x483   :  { %779 = vsyncpa [#allocation9], 1 }
 0x484   :  { %780 = vsyncpa [#allocation12], 1 }
 0x485   :  { %781 = vsyncpa [#allocation4], 1 }
 0x486   :  { %783 = vsyncpa [#allocation4 + $0x1], 1 }

// kernel: tpu_custom_call.1
= control target key start
LH: loop header
LB: loop body
LE: loop exit
PB: predicated region body
PF: predicated region fallthrough
CT: control target
= control target key end

     0   :  { %s1797_s0 = inlined_call_operand.hbm [shape: bf16[16,16], index: 0, kind: input, shape index: {}]   ;;  %s1798_s1 = inlined_call_operand.hbm [shape: bf16[16,16], index: 1, kind: input, shape index: {}]   ;;  %s1799_s2 = inlined_call_operand.hbm [shape: f32[4,32], index: 2, kind: input, shape index: {}]   ;;  %s1800_s3 = inlined_call_operand.hbm [shape: bf16[16,32], index: 3, kind: input, shape index: {}]   ;;  %s1801_s4 = inlined_call_operand.hbm [shape: bf16[32,32], index: 4, kind: input, shape index: {}]   ;;  %s1802_s5 = inlined_call_operand.vmem [shape: bf16[32,32], index: 5, kind: input, shape index: {}]   ;;  %s1803_s6 = inlined_call_operand.hbm [shape: bf16[16,32], index: 6, kind: input, shape index: {}]   ;;  %s1804_s7 = inlined_call_operand.hbm [shape: bf16[32,32], index: 7, kind: input, shape index: {}]   ;;  %s1805_s8 = inlined_call_operand.hbm [shape: f32[16,32], index: 8, kind: output, shape index: {}]  }
   0x1   :  { %1810 = sst [smem:[#allocation21_spill]] %s1799_s2 }
   0x2   :  { %1811 = sst [smem:[#allocation22_spill]] %s1800_s3 }
   0x3   :  { %1812 = sst [smem:[#allocation23_spill]] %s1801_s4 }
   0x4   :  { %1813 = sst [smem:[#allocation24_spill]] %s1803_s6 }
   0x5   :  { %1814 = sst [smem:[#allocation25_spill]] %s1804_s7 }
   0x6   :  { %13 = vsyncpa [#allocation3], 0 }
   0x7   :  { %15 = vsyncpa [#allocation3 + $0x1], 0 }
   0x8   :  { %16 = vsyncpa [#allocation6], 0 }
   0x9   :  { %18 = vsyncpa [#allocation6 + $0x1], 0 }
   0xa   :  { %19 = vsyncpa [#allocation9], 0 }
   0xb   :  { %20 = vsyncpa [#allocation12], 0 }
   0xc   :  { %21 = vsyncpa [#allocation4], 0 }
   0xd   :  { %23 = vsyncpa [#allocation4 + $0x1], 0  ;;  %s1441_s27 = smov 0   ;;  %s1443_s28 = smov 0  }
   0xe   :  { %s1445_s29 = smov 0   ;;  %s1447_s30 = smov 0  }
   0xf LB: > { %s1384_s9 = smov [#allocation7]   ;;  %s1462_s11 = sadd.s32 4294967295, %s1382_s30   ;;  %s1382_s30 = sphi %s1447_s30, %s1842_s30   ;;  %s1378_s29 = sphi %s1445_s29, %s1841_s29   ;;  %s1374_s28 = sphi %s1443_s28, %s1840_s28   ;;  %s1370_s27 = sphi %s1441_s27, %s1839_s27  }
  0x10   : > { %s251_s10 = sshll.u32 %s1384_s9, 4  ;;  %p896_p0 = scmp.ge.s32.totalorder %s1382_s30, 1  ;;  %s252_s10 = int_to_ptr.vmem [resolvable:$true] %s251_s10 }
  0x11   : > { %p1806_p1 = scmp.eq.s32.totalorder %s1462_s11, 0  ;;  %p238_p2 = scmp.lt.s32.totalorder %s1382_s30, 3 }
  0x12   : > { %s1385_s13 = smov [#allocation8]   ;;  %s1386_s16 = smov [#allocation11]  }
  0x13   : > { %p1467_p3 = pnand %p896_p0, %p238_p2  ;;  %s261_s14 = sshll.u32 %s1385_s13, 4  ;;  %s1474_s14 = int_to_ptr.vmem [resolvable:$true] %s261_s14 }
  0x14   : > { %s290_s17 = sshll.u32 %s1386_s16, 4  ;;  %s1817_s2 = sld [smem:[#allocation21_spill]]  ;;  %s1482_s17 = int_to_ptr.vmem [resolvable:$true] %s290_s17 }
  0x15   : > { %s1815_s12 = scalar_select %p1467_p3, 1, 0 }
  0x16   : > { %p1012_p5 = pneg %p1467_p3 }
  0x18   : > { %p1478_p6 = pnand %p1012_p5, %p1806_p1 }
  0x1a   : > { %s1100_s20 = scalar_lea.hbm %s1817_s2, 64  ;;  %p1492_p8 = pneg %p1478_p6 }
  0x1b   : > { %p1101_p7 = scmp.ne.s32.totalorder %s1817_s2, %s1100_s20  ;;  %p1107_p11 = scmp.lt.u32.totalorder %s1100_s20, %s1817_s2 }
  0x1d   : > { %p1103_p9 = pnand %p1492_p8, %p1101_p7 }
  0x1f   : > { %p1104_p10 = pneg %p1103_p9 }
  0x21   : > { %p1109_p12 = pnand %p1107_p11, %p1104_p10 }
  0x23   : > { %1112 = shalt.err (!%p1109_p12)
}
  0x24   : > { %s1113_s26 = scalar_lea.vmem %s252_s10, 64  ;;  %p1121_p5 = scmp.lt.s32.totalorder %s252_s10, %s252_s10 }
  0x25   : > { %p1114_p13 = scmp.ne.s32.totalorder %s252_s10, %s1113_s26  ;;  %p1122_p4 = scmp.lt.s32.totalorder %s1113_s26, %s1113_s26 }
  0x27   : > { %p1116_p0 = pnand %p1114_p13, %p1492_p8  ;;  %p1123_p1 = por %p1122_p4, %p1121_p5 }
  0x29   : > { %p1117_p2 = pneg %p1116_p0 }
  0x2b   : > { %p1124_p3 = pnand %p1123_p1, %p1117_p2 }
  0x2d   : > { %1127 = shalt.err (!%p1124_p3)
}
  0x2e   : > { %1015 = dma.hbm_to_vmem [thread:$0]  (!%p1478_p6), %s1817_s2, 64, %s252_s10, [#allocation6]  }
  0x2f   : > { %s1819_s3 = sld [smem:[#allocation22_spill]] }
  0x35   : > { %s1128_s19 = scalar_lea.hbm %s1819_s3, 128 }
  0x36   : > { %p1129_p7 = scmp.ne.s32.totalorder %s1819_s3, %s1128_s19  ;;  %p1135_p1 = scmp.lt.u32.totalorder %s1128_s19, %s1819_s3 }
  0x38   : > { %p1131_p9 = pnand %p1129_p7, %p1492_p8 }
  0x3a   : > { %p1132_p4 = pneg %p1131_p9 }
  0x3c   : > { %p1137_p3 = pnand %p1135_p1, %p1132_p4 }
  0x3e   : > { %1140 = shalt.err (!%p1137_p3)
}
  0x3f   : > { %s1141_s10 = scalar_lea.vmem %s1474_s14, 128  ;;  %p1149_p13 = scmp.lt.s32.totalorder %s1474_s14, %s1474_s14 }
  0x40   : > { %p1142_p10 = scmp.ne.s32.totalorder %s1474_s14, %s1141_s10  ;;  %p1150_p0 = scmp.lt.s32.totalorder %s1141_s10, %s1141_s10 }
  0x42   : > { %p1144_p11 = pnand %p1142_p10, %p1492_p8  ;;  %p1151_p2 = por %p1150_p0, %p1149_p13 }
  0x44   : > { %p1145_p12 = pneg %p1144_p11 }
  0x46   : > { %p1152_p5 = pnand %p1151_p2, %p1145_p12 }
  0x48   : > { %1155 = shalt.err (!%p1152_p5)
}
  0x49   : > { %s1387_s25 = smov 64   ;;  %s1388_s26 = smov 4  }
  0x4a   : > { %1018 = dma.hbm_to_vmem [thread:$0]  (!%p1478_p6), %s1819_s3, 128, %s1474_s14, [#allocation9], %s1387_s25, %s1387_s25, %s1388_s26  }
  0x4b   : > { %s1820_s6 = sld [smem:[#allocation24_spill]] }
  0x51   : > { %s1156_s19 = scalar_lea.hbm %s1820_s6, 128 }
  0x52   : > { %p1157_p7 = scmp.ne.s32.totalorder %s1820_s6, %s1156_s19  ;;  %p1163_p1 = scmp.lt.u32.totalorder %s1156_s19, %s1820_s6 }
  0x54   : > { %p1159_p9 = pnand %p1157_p7, %p1492_p8 }
  0x56   : > { %p1160_p4 = pneg %p1159_p9 }
  0x58   : > { %p1165_p3 = pnand %p1163_p1, %p1160_p4 }
  0x5a   : > { %1168 = shalt.err (!%p1165_p3)
}
  0x5b   : > { %s1169_s14 = scalar_lea.vmem %s1482_s17, 128  ;;  %p1177_p13 = scmp.lt.s32.totalorder %s1482_s17, %s1482_s17 }
  0x5c   : > { %p1170_p10 = scmp.ne.s32.totalorder %s1482_s17, %s1169_s14  ;;  %p1178_p0 = scmp.lt.s32.totalorder %s1169_s14, %s1169_s14 }
  0x5e   : > { %p1172_p11 = pnand %p1170_p10, %p1492_p8  ;;  %p1179_p2 = por %p1178_p0, %p1177_p13 }
  0x60   : > { %p1173_p12 = pneg %p1172_p11 }
  0x62   : > { %p1180_p5 = pnand %p1179_p2, %p1173_p12 }
  0x64   : > { %1183 = shalt.err (!%p1180_p5)
}
  0x65   : > { %1024 = dma.hbm_to_vmem [thread:$0]  (!%p1478_p6), %s1820_s6, 128, %s1482_s17, [#allocation12], %s1387_s25, %s1387_s25, %s1388_s26  }
  0x66   : > { %s1389_s13 = smov [#allocation10]   ;;  %s1390_s18 = smov [#allocation13]  }
  0x67   : > { %s274_s16 = sshll.u32 %s1389_s13, 4  ;;  %s303_s19 = sshll.u32 %s1390_s18, 4  ;;  %s275_s16 = int_to_ptr.vmem [resolvable:$true] %s274_s16  ;;  %s304_s19 = int_to_ptr.vmem [resolvable:$true] %s303_s19 }
  0x68   : > { %s1821_s4 = sld [smem:[#allocation23_spill]] }
  0x6e   : > { %s1184_s22 = scalar_lea.hbm %s1821_s4, 256 }
  0x6f   : > { %p1185_p7 = scmp.ne.s32.totalorder %s1821_s4, %s1184_s22  ;;  %p1191_p1 = scmp.lt.u32.totalorder %s1184_s22, %s1821_s4 }
  0x71   : > { %p1187_p9 = pnand %p1185_p7, %p1492_p8 }
  0x73   : > { %p1188_p4 = pneg %p1187_p9 }
  0x75   : > { %p1193_p3 = pnand %p1191_p1, %p1188_p4 }
  0x77   : > { %1196 = shalt.err (!%p1193_p3)
}
  0x78   : > { %s1197_s17 = scalar_lea.vmem %s275_s16, 256  ;;  %p1205_p13 = scmp.lt.s32.totalorder %s275_s16, %s275_s16 }
  0x79   : > { %p1198_p10 = scmp.ne.s32.totalorder %s275_s16, %s1197_s17  ;;  %p1206_p0 = scmp.lt.s32.totalorder %s1197_s17, %s1197_s17 }
  0x7b   : > { %p1200_p11 = pnand %p1198_p10, %p1492_p8  ;;  %p1207_p2 = por %p1206_p0, %p1205_p13 }
  0x7d   : > { %p1201_p12 = pneg %p1200_p11 }
  0x7f   : > { %p1208_p5 = pnand %p1207_p2, %p1201_p12 }
  0x81   : > { %1211 = shalt.err (!%p1208_p5)
}
  0x82   : > { %1021 = dma.hbm_to_vmem [thread:$0]  (!%p1478_p6), %s1821_s4, 256, %s275_s16, [#allocation9], %s1387_s25, %s1387_s25, %s1388_s26  }
  0x83   : > { %s1822_s7 = sld [smem:[#allocation25_spill]] }
  0x89   : > { %s1212_s20 = scalar_lea.hbm %s1822_s7, 256 }
  0x8a   : > { %p1213_p7 = scmp.ne.s32.totalorder %s1822_s7, %s1212_s20  ;;  %p1219_p1 = scmp.lt.u32.totalorder %s1212_s20, %s1822_s7 }
  0x8c   : > { %p1215_p9 = pnand %p1213_p7, %p1492_p8 }
  0x8e   : > { %p1216_p4 = pneg %p1215_p9 }
  0x90   : > { %p1221_p3 = pnand %p1219_p1, %p1216_p4 }
  0x92   : > { %1224 = shalt.err (!%p1221_p3)
}
  0x93   : > { %s1225_s10 = scalar_lea.vmem %s304_s19, 256  ;;  %p1233_p13 = scmp.lt.s32.totalorder %s304_s19, %s304_s19 }
  0x94   : > { %p1226_p10 = scmp.ne.s32.totalorder %s304_s19, %s1225_s10  ;;  %p1234_p0 = scmp.lt.s32.totalorder %s1225_s10, %s1225_s10 }
  0x96   : > { %p1228_p11 = pnand %p1226_p10, %p1492_p8  ;;  %p1235_p2 = por %p1234_p0, %p1233_p13 }
  0x98   : > { %p1229_p12 = pneg %p1228_p11 }
  0x9a   : > { %p1236_p5 = pnand %p1235_p2, %p1229_p12 }
  0x9c   : > { %1239 = shalt.err (!%p1236_p5)
}
  0x9d   : > { %1027 = dma.hbm_to_vmem [thread:$0]  (!%p1478_p6), %s1822_s7, 256, %s304_s19, [#allocation12], %s1387_s25, %s1387_s25, %s1388_s26  }
  0x9e   : > { %s895_s15 = sadd.s32 4294967294, %s1382_s30   ;;  %s1604_s23 = sadd.s32 1, %s1382_s30  }
  0x9f   : > { %s36_s2 = sadd.s32 1, %s1378_s29  ;;  %s33_s9 = ssub.s32 %s1382_s30, %s1604_s23 }
  0xa0   : > { %p43_p8 = scmp.ne.s32.totalorder %s1378_s29, %s1374_s28  ;;  %p34_p7 = scmp.eq.s32.totalorder %s33_s9, 0 }
  0xa1   : > { %p44_p9 = scmp.eq.s32.totalorder %s1382_s30, 0  ;;  %p49_p4 = scmp.ne.s32.totalorder %s1374_s28, %s1370_s27 }
  0xa2   : > { %p225_p1 = scmp.eq.s32.totalorder %s1462_s11, 1  ;;  %p1823_p10 = scmp.eq.s32.totalorder %s1462_s11, 0 }
  0xa3   : > { %s1616_s13 = scalar_select %p34_p7, %s1378_s29, %s36_s2  }
  0xa4   : > { %p45_p3 = por %p44_p9, %p43_p8  ;;  %p1620_p11 = por %p1823_p10, %p49_p4 }
  0xa5   : > { %p1624_p6 = por %p225_p1, %p43_p8  ;;  %p231_p12 = scmp.eq.s32.totalorder %s895_s15, 1 }
  0xa6   : > { %s1824_s18 = scalar_select %p1620_p11, 1, 0 }
  0xa7   : > { %s1825_s25 = scalar_select %p1624_p6, 1, 0 }
  0xa8   : > { %p1044_p13 = scmp.lt.s32.totalorder %s1382_s30, 2  ;;  %s317_s26 = sand.u32 1, %s1378_s29  }
  0xa9   : > { %p1630_p0 = por %p231_p12, %p49_p4  ;;  %s1634_s20 = sshll.u32 %s317_s26, 2 }
  0xaa   : > { %s904_s21 = sshll.u32 %s1382_s30, 6  ;;  %s321_s10 = scalar_lea.vmem [#allocation2], %s1634_s20 }
  0xab   : > { %s1826_s19 = scalar_select %p1630_p0, 1, 0 }
  0xac   : > { %s1640_s14 = scalar_lea.hbm %s1797_s0, %s904_s21  ;;  %s328_s16 = sshll.u32 %s321_s10, 4  ;;  %s1647_s16 = int_to_ptr.vmem [resolvable:$true] %s328_s16 }
  0xad   : > { %p1643_p2 = pnand %p1044_p13, %p45_p3  ;;  %s1652_s9 = scalar_lea.hbm %s1798_s1, %s904_s21 }
  0xae   : > { %s318_s22 = scalar_lea.sflag [#allocation3], %s317_s26  ;;  %s1240_s24 = scalar_lea.hbm %s1640_s14, 64 }
  0xaf   : > { %p1241_p5 = scmp.ne.s32.totalorder %s1640_s14, %s1240_s24  ;;  %p1242_p8 = pneg %p1643_p2 }
  0xb0   : > { %s1245_s4 = scalar_lea.hbm %s1797_s0, 128  ;;  %p1246_p4 = scmp.lt.u32.totalorder %s1640_s14, %s1797_s0 }
  0xb1   : > { %p1243_p7 = pnand %p1242_p8, %p1241_p5  ;;  %p1247_p1 = scmp.lt.u32.totalorder %s1245_s4, %s1240_s24 }
  0xb2   : > { %p1249_p10 = scmp.lt.u32.totalorder %s1240_s24, %s1640_s14 }
  0xb3   : > { %p1244_p9 = pneg %p1243_p7  ;;  %p1248_p3 = por %p1247_p1, %p1246_p4 }
  0xb5   : > { %p1250_p12 = por %p1249_p10, %p1248_p3 }
  0xb7   : > { %p1251_p13 = pnand %p1250_p12, %p1244_p9 }
  0xb9   : > { %1254 = shalt.err (!%p1251_p13)
}
  0xba   : > { %s1255_s26 = scalar_lea.vmem %s1647_s16, 64  ;;  %s1391_s3 = smov [#allocation2]  }
  0xbb   : > { %p1256_p5 = scmp.ne.s32.totalorder %s1647_s16, %s1255_s26  ;;  %s1260_s21 = sshll.u32 %s1391_s3, 4  ;;  %s1261_s21 = int_to_ptr.vmem [resolvable:$false] %s1260_s21 }
  0xbc   : > { %s1262_s6 = scalar_lea.vmem %s1261_s21, 128  ;;  %p1263_p6 = scmp.lt.s32.totalorder %s1647_s16, %s1261_s21 }
  0xbd   : > { %p1258_p7 = pnand %p1256_p5, %p1242_p8  ;;  %p1264_p4 = scmp.lt.s32.totalorder %s1262_s6, %s1255_s26 }
  0xbf   : > { %p1259_p0 = pneg %p1258_p7  ;;  %p1265_p1 = por %p1264_p4, %p1263_p6 }
  0xc1   : > { %p1266_p3 = pnand %p1265_p1, %p1259_p0 }
  0xc3   : > { %1269 = shalt.err (!%p1266_p3)
}
  0xc4   : > { %1031 = dma.hbm_to_vmem [thread:$0]  (!%p1643_p2), %s1640_s14, 64, %s1647_s16, %s318_s22  }
  0xc5   : > { %s335_s4 = sand.u32 1, %s1382_s30   ;;  %s339_s7 = scalar_lea.vmem [#allocation5], %s1634_s20 }
  0xc6   : > { %s346_s15 = sshll.u32 %s339_s7, 4  ;;  %s336_s2 = scalar_lea.sflag [#allocation6], %s335_s4  ;;  %s347_s15 = int_to_ptr.vmem [resolvable:$true] %s346_s15 }
  0xc7   : > { %s1270_s24 = scalar_lea.hbm %s1652_s9, 64  ;;  %s1275_s3 = scalar_lea.hbm %s1798_s1, 128 }
  0xc8   : > { %p1271_p6 = scmp.ne.s32.totalorder %s1652_s9, %s1270_s24  ;;  %p1276_p10 = scmp.lt.u32.totalorder %s1652_s9, %s1798_s1 }
  0xc9   : > { %p1277_p12 = scmp.lt.u32.totalorder %s1275_s3, %s1270_s24  ;;  %p1279_p5 = scmp.lt.u32.totalorder %s1270_s24, %s1652_s9 }
  0xca   : > { %p1273_p0 = pnand %p1271_p6, %p1242_p8 }
  0xcb   : > { %p1278_p13 = por %p1277_p12, %p1276_p10 }
  0xcc   : > { %p1274_p9 = pneg %p1273_p0 }
  0xcd   : > { %p1280_p7 = por %p1279_p5, %p1278_p13 }
  0xcf   : > { %p1281_p4 = pnand %p1280_p7, %p1274_p9 }
  0xd1   : > { %1284 = shalt.err (!%p1281_p4)
}
  0xd2   : > { %s1285_s20 = scalar_lea.vmem %s347_s15, 64  ;;  %s1392_s14 = smov [#allocation5]  }
  0xd3   : > { %p1286_p1 = scmp.ne.s32.totalorder %s347_s15, %s1285_s20  ;;  %s1290_s16 = sshll.u32 %s1392_s14, 4  ;;  %s1291_s16 = int_to_ptr.vmem [resolvable:$false] %s1290_s16 }
  0xd4   : > { %s1292_s22 = scalar_lea.vmem %s1291_s16, 128  ;;  %p1293_p0 = scmp.lt.s32.totalorder %s347_s15, %s1291_s16 }
  0xd5   : > { %p1288_p3 = pnand %p1286_p1, %p1242_p8  ;;  %p1294_p11 = scmp.lt.s32.totalorder %s1292_s22, %s1285_s20 }
  0xd7   : > { %p1289_p6 = pneg %p1288_p3  ;;  %p1295_p10 = por %p1294_p11, %p1293_p0 }
  0xd9   : > { %p1296_p12 = pnand %p1295_p10, %p1289_p6 }
  0xdb   : > { %1299 = shalt.err (!%p1296_p12)
}
  0xdc   : > { %1034 = dma.hbm_to_vmem [thread:$0]  (!%p1643_p2), %s1652_s9, 64, %s347_s15, %s336_s2  }
  0xdd   : > { %p1828_p9 = scmp.ne.s32.totalorder %s1815_s12, 0 }
  0xde   : > { %s1703_s4 = sand.u32 (!%p1828_p9), 1, %s1374_s28   ;;  %p1829_p8 = scmp.ne.s32.totalorder (!%p1828_p9), %s1824_s18, 0 }
  0xdf   : > { %355 = sbr.rel (%p1828_p9) target bundleno = 1136 (0x470), region = 52  ;;  %s908_s7 = sshll.u32 (!%p1828_p9), %s1703_s4, 2 }
  0xe0   : > { %s358_s24 = scalar_lea.sflag (!%p1828_p9), [#allocation3], %s1703_s4  ;;  %s361_s10 = scalar_lea.vmem (!%p1828_p9), [#allocation2], %s908_s7 }
  0xe6   : > { %1345 = dma.done.wait (%p1829_p8), %s358_s24, 64  }
  0xe7   : > { %1347 = vsyncadd (%p1829_p8), %s358_s24, 4294967232  ;;  %s366_s17 = sand.u32 1, %s1462_s11   ;;  %s1712_s12 = scalar_lea.vmem [#allocation5], %s908_s7 }
  0xe8   : > { %s367_s9 = scalar_lea.sflag [#allocation6], %s366_s17 }
  0xe9   : > { %1349 = dma.done.wait (%p1829_p8), %s367_s9, 64  }
  0xea   : > { %1351 = vsyncadd (%p1829_p8), %s367_s9, 4294967232  ;;  %p1830_p11 = scmp.eq.s32.totalorder %s1462_s11, 0 }
  0xec   : > { %1353 = dma.done.wait (%p1830_p11), [#allocation6], 64   ;;  %p1831_p2 = pmov %p1830_p11 }
  0xee   : > { %1355 = vsyncadd (%p1831_p2), [#allocation6], 4294967232  ;;  %p1832_p13 = pmov %p1831_p2 }
  0xef   : > { %p1833_p5 = pmov %p1831_p2 }
  0xf0   : > { %1357 = dma.done.wait (%p1832_p13), [#allocation9], 384  }
  0xf1   : > { %1359 = vsyncadd (%p1833_p5), [#allocation9], 4294966912  ;;  %p1834_p7 = pmov %p1831_p2 }
  0xf2   : > { %p1835_p4 = pmov %p1831_p2 }
  0xf3   : > { %1361 = dma.done.wait (%p1834_p7), [#allocation12], 384  }
  0xf4   : > { %1363 = vsyncadd (%p1835_p4), [#allocation12], 4294966912  ;;  %v1393_v0 = vmov 0.0   ;;  %vm1394_vm0 = vmmov 0   ;;  %v1092_v1 = vld [vmem:[#allocation8] sm:$0xff]   ;;  %vm444_vm1 = vcmask 130048  }
  0xf5   : > { %950 = vmatprep.subr.bf16.mxu0 %v1393_v0  ;;  %952 = vmatprep.mubr.msk.bf16.mxu0 %vm1394_vm0, %v1393_v0  ;;  %v429_v2 = vld [vmem:[%s361_s10] sm:$0xf]  ;;  %v1095_v5 = vld [vmem:[#allocation11] sm:$0xff]   ;;  %vm511_vm2 = vcmask 261120   ;;  %v1097_v15 = vld [vmem:[%s1802_s5 + $0x8] sm:$0xff]   ;;  %s915_s3 = sshll.u32 %s1703_s4, 3 }
  0xf6   : > { %956 = vmatprep.subr.bf16.mxu1 %v1393_v0  ;;  %960 = vmatprep.mubr.msk.bf16.mxu1 %vm1394_vm0, %v1393_v0  ;;  %v1093_v3 = vld [vmem:[#allocation10] sm:$0xff]   ;;  %v1094_v4 = vld [vmem:[#allocation10 + $0x8] sm:$0xff]   ;;  %v916_v6 = vld [vmem:[#allocation7] ss:$0 sm:$0xff]  ;;  %s934_s21 = sshll.u32 %s1462_s11, 7  ;;  %s427_s6 = scalar_lea.vmem [#allocation14], %s915_s3 }
  0xf7   : > { %951 = vmatpush3.bf16.msra.mxu0 %v1092_v1  ;;  %957 = vmatpush3.bf16.msra.mxu1 %v1093_v3  ;;  %v1096_v13 = vld [vmem:[%s1802_s5] sm:$0xff]   ;;  %v430_v16 = vld [vmem:[%s1712_s12] sm:$0xf]  ;;  %v1099_v30 = vld [vmem:[#allocation13 + $0x8] sm:$0xff]   ;;  %s755_s20 = sshll.u32 %s427_s6, 4  ;;  %s1752_s22 = scalar_lea.hbm %s1805_s8, %s934_s21  ;;  %s1754_s20 = int_to_ptr.vmem [resolvable:$true] %s755_s20 }
  0xf8   : > { %964 = vmatprep.subr.bf16.mxu0 %v1393_v0  ;;  %958 = vmatprep.subr.bf16.mxu1 %v1393_v0  ;;  %v919_v17 = vld [vmem:[#allocation7 + $0x1] ss:$0 sm:$0xff]  ;;  %v1098_v29 = vld [vmem:[#allocation13] sm:$0xff]   ;;  %v928_v32 = vld [vmem:[#allocation7 + $0x2] ss:$0 sm:$0xff]  ;;  %s742_s11 = scalar_lea.sflag [#allocation4], %s1703_s4 }
  0xf9   : > { %v929_v40 = vld [vmem:[#allocation7 + $0x3] ss:$0 sm:$0xff]  ;;  %s1300_s7 = scalar_lea.vmem %s1754_s20, 128  ;;  %p1836_p3 = scmp.ne.s32.totalorder %s1825_s25, 0 }
  0xfa   : > { %953 = vmatmul.mubr.msk.bf16.vlgmr.msra.gmra.mrb[0].mxu0 %vm444_vm1, %v429_v2  ;;  %p1301_p1 = scmp.ne.s32.totalorder %s1754_s20, %s1300_s7  ;;  %s1395_s24 = smov [#allocation14]  }
  0xfb   : > { %966 = vmatprep.mubr.msk.bf16.mxu0 %vm1394_vm0, %v1393_v0  ;;  %959 = vmatpush3.bf16.msra.mxu1 %v1094_v4  ;;  %s1304_s10 = sshll.u32 %s1395_s24, 4  ;;  %s1305_s10 = int_to_ptr.vmem [resolvable:$false] %s1304_s10 }
  0xfc   : > { %970 = vmatprep.subr.bf16.mxu1 %v1393_v0  ;;  %965 = vmatpush3.bf16.msra.mxu0 %v1095_v5  ;;  %p1302_p6 = pnand %p1301_p1, %p1836_p3  ;;  %s1306_s17 = scalar_lea.vmem %s1305_s10, 256 }
  0xfd   : > { %978 = vmatprep.subr.bf16.mxu0 %v1393_v0  ;;  %p1307_p10 = scmp.lt.s32.totalorder %s1754_s20, %s1305_s10  ;;  %p1308_p12 = scmp.lt.s32.totalorder %s1306_s17, %s1300_s7 }
  0xfe   : > { %p1303_p0 = pneg %p1302_p6 }
  0xff   : > { %p1309_p9 = por %p1308_p12, %p1307_p10 }
 0x101   : > { %p1310_p8 = pnand %p1309_p9, %p1303_p0 }
 0x102   : > { %967 = vmatmul.mubr.msk.bf16.vlgmr.msra.gmra.mrb[4].mxu0 %vm444_vm1, %v430_v16 }
 0x103   : > { %982 = vmatprep.mubr.msk.bf16.mxu0 %vm1394_vm0, %v1393_v0  ;;  %979 = vmatpush3.bf16.msra.mxu0 %v1098_v29 }
 0x104   : > { %980 = vmatprep.subr.bf16.mxu0 %v1393_v0 }
 0x107   : > { %981 = vmatpush3.bf16.msra.mxu0 %v1099_v30 }
 0x1cd   : > { %v482_v7 = vpop.f32.mrb[0].mxu0 }
 0x1ce   : > { %v483_v8 = vadd.f32 %v916_v6, %v482_v7  ;;  %v954_v9 = vpop.f32.mrb[1].mxu0 }
 0x1cf   : > { %v485_v10 = vpop.f32.mrb[2].mxu0 }
 0x1d0   : > { %v488_v11 = vmax.f32 %v483_v8, 0.0  ;;  %v955_v12 = vpop.f32.mrb[3].mxu0 }
 0x1d2   : > { %v489_v14 = vpack.c.bf16 %v488_v11, %v488_v11 }
 0x1d4   : > { %961 = vmatmul.mubr.msk.bf16.vlgmr.msra.gmra.mrb[0].mxu1 %vm511_vm2, %v489_v14 }
 0x1d5   : > { %971 = vmatpush3.bf16.msra.mxu1 %v1096_v13  ;;  %974 = vmatprep.mubr.msk.bf16.mxu1 %vm1394_vm0, %v1393_v0  ;;  %v606_v25 = vpop.f32.mrb[4].mxu0 }
 0x1d6   : > { %972 = vmatprep.subr.bf16.mxu1 %v1393_v0  ;;  %v968_v26 = vpop.f32.mrb[5].mxu0 }
 0x1d7   : > { %v609_v27 = vpop.f32.mrb[6].mxu0 }
 0x1d8   : > { %v969_v28 = vpop.f32.mrb[7].mxu0 }
 0x1d9   : > { %973 = vmatpush3.bf16.msra.mxu1 %v1097_v15 }
 0x2a7   : > { %v549_v18 = vpop.f32.mrb[0].mxu1 }
 0x2a8   : > { %v550_v19 = vadd.f32 %v919_v17, %v549_v18  ;;  %v962_v20 = vpop.f32.mrb[1].mxu1 }
 0x2a9   : > { %v552_v21 = vpop.f32.mrb[2].mxu1 }
 0x2aa   : > { %v555_v22 = vmax.f32 %v550_v19, 0.0  ;;  %v963_v23 = vpop.f32.mrb[3].mxu1 }
 0x2ac   : > { %v556_v24 = vpack.c.bf16 %v555_v22, %v555_v22 }
 0x2ae   : > { %975 = vmatmul.mubr.msk.bf16.vlgmr.msra.gmra.mrb[4].mxu1 %vm511_vm2, %v556_v24 }
 0x381   : > { %v661_v31 = vpop.f32.mrb[4].mxu1 }
 0x382   : > { %v662_v33 = vadd.f32 %v661_v31, %v606_v25  ;;  %v976_v34 = vpop.f32.mrb[5].mxu1 }
 0x383   : > { %v664_v35 = vpop.f32.mrb[6].mxu1 }
 0x384   : > { %v672_v36 = vadd.f32 %v928_v32, %v662_v33  ;;  %v977_v37 = vpop.f32.mrb[7].mxu1 }
 0x386   : > { %v673_v38 = vmax.f32 %v672_v36, 0.0 }
 0x388   : > { %v674_v39 = vpack.c.bf16 %v673_v38, %v673_v38 }
 0x38a   : > { %983 = vmatmul.mubr.msk.bf16.vlgmr.msra.gmra.mrb[8].mxu0 %vm511_vm2, %v674_v39 }
 0x45d   : > { %v733_v41 = vpop.f32.mrb[8].mxu0 }
 0x45e   : > { %v734_v42 = vadd.f32 %v929_v40, %v733_v41  ;;  %v984_v43 = vpop.f32.mrb[9].mxu0 }
 0x45f   : > { %v736_v44 = vpop.f32.mrb[10].mxu0 }
 0x460   : > { %v739_v45 = vmax.f32 %v734_v42, 0.0  ;;  %v985_v46 = vpop.f32.mrb[11].mxu0 }
 0x462   : > { %740 = vst.msk [vmem:[%s427_s6] sm:$0xff] %vm511_vm2, %v739_v45 }
 0x463   : > { %1313 = shalt.err (!%p1310_p8)
}
 0x464   : > { %s1314_s4 = scalar_lea.hbm %s1752_s22, 128  ;;  %s1318_s18 = scalar_lea.hbm %s1805_s8, 256 }
 0x465   : > { %p1315_p11 = scmp.ne.s32.totalorder %s1752_s22, %s1314_s4  ;;  %p1319_p5 = scmp.lt.u32.totalorder %s1752_s22, %s1805_s8 }
 0x466   : > { %p1320_p7 = scmp.lt.u32.totalorder %s1318_s18, %s1314_s4  ;;  %p1322_p1 = scmp.lt.u32.totalorder %s1314_s4, %s1752_s22 }
 0x467   : > { %p1316_p2 = pnand %p1315_p11, %p1836_p3 }
 0x468   : > { %p1321_p4 = por %p1320_p7, %p1319_p5 }
 0x469   : > { %p1317_p13 = pneg %p1316_p2 }
 0x46a   : > { %p1323_p6 = por %p1322_p1, %p1321_p4 }
 0x46c   : > { %p1324_p0 = pnand %p1323_p6, %p1317_p13 }
 0x46e   : > { %1327 = shalt.err (!%p1324_p0)
}
 0x46f   : > { %1010 = dma.vmem_to_hbm [thread:$0]  (%p1836_p3), %s1754_s20, 128, %s1752_s22, %s742_s11  }
 0x470 PF: > { %s767_s26 = sand.u32 1, %s1370_s27   ;;  %p1837_p10 = scmp.ne.s32.totalorder %s1826_s19, 0 }
 0x471   : > { %p1838_p12 = scmp.ge.s32.totalorder %s1382_s30, 2  ;;  %s768_s3 = scalar_lea.sflag [#allocation4], %s767_s26 }
 0x473   : > { %p1036_p9 = pnand %p1838_p12, %p1837_p10 }
 0x475   : > { %1365 = dma.done.wait (!%p1036_p9), %s768_s3, 128  }
 0x476   : > { %1367 = vsyncadd (!%p1036_p9), %s768_s3, 4294967168  ;;  %p26_p8 = scmp.ge.s32.totalorder %s1604_s23, 4   ;;  %s1839_s27 = smov %s1374_s28 }
 0x477   : > { %s1840_s28 = smov %s1378_s29  ;;  %s1841_s29 = smov %s1616_s13 }
 0x478   : > { %s1842_s30 = smov %s1604_s23  ;;  %28 = sbr.rel (!%p26_p8) target bundleno = 15 (0xf), region = 130 }
 0x47f   :  { %773 = vsyncpa [#allocation3], 1 }
 0x480   :  { %775 = vsyncpa [#allocation3 + $0x1], 1 }
 0x481   :  { %776 = vsyncpa [#allocation6], 1 }
 0x482   :  { %778 = vsyncpa [#allocation6 + $0x1], 1 }
 0x483   :  { %779 = vsyncpa [#allocation9], 1 }
 0x484   :  { %780 = vsyncpa [#allocation12], 1 }
 0x485   :  { %781 = vsyncpa [#allocation4], 1 }
 0x486   :  { %783 = vsyncpa [#allocation4 + $0x1], 1 }

</bundles_post_ra>
